<compile_context>
chip_gen: v7x
topology: tpu7x:2x2x1
jax: 0.10.0
libtpu: 0.0.40
codegen_flags: <defaults>
</compile_context>

<pallas_src>
import functools

import jax
import jax.numpy as jnp
from jax.experimental import pallas as pl
from jax.experimental.pallas import tpu as pltpu

_CPAD = 128  # lane-dense channel width
_PPAD = 128  # lane-dense classifier width


# ---------------------------------------------------------------------------
# Fused kernel (one grid step = Bb stacked batch elements, slab of Bb*T rows)
# ---------------------------------------------------------------------------

def _dwformer_fused_kernel(
    x_ref, cmask_ref,
    ln1_g_ref, ln1_b_ref, ln2_g_ref, ln2_b_ref, ln3_g_ref, ln3_b_ref,
    prevm_ref, nextm_ref, conv_w_ref,
    wqkv_ref, head_mask_ref, rep_ref, bias_ref, sel_ref, wp_ref, bp_ref,
    pool_ref, w1_ref, b1_ref, w2_ref, b2_ref, w3_ref, b3_ref,
    out_ref, *, c_actual, c_pad):
  x = x_ref[...].astype(jnp.float32)                     # (N, Cp) slab
  n_rows = x.shape[0]
  inv_c = 1.0 / c_actual
  cmask = cmask_ref[...]                                  # (1, Cp) valid lanes

  def layer_norm(v, g, b):
    # Moments over the *actual* C channels only; padded lanes are zero on the
    # way in and stay zero on the way out (gamma/beta are zero-padded).
    mean = jnp.sum(v, axis=-1, keepdims=True) * inv_c
    d = (v - mean) * cmask
    var = jnp.sum(d * d, axis=-1, keepdims=True) * inv_c
    return d * jax.lax.rsqrt(var + 1e-5) * g + b

  # ---- ln1 -----------------------------------------------------------------
  x = layer_norm(x, ln1_g_ref[...], ln1_b_ref[...])

  # ---- DynamicConv (kernel_size=3, padding=1, no bias) -----------------------
  # Time shifts on the XLU via sublane roll; precomputed masks zero the t=0 /
  # t=T-1 rows (also the cross-batch-element wraparound rows of the slab).
  x_prev = pltpu.roll(x, shift=1, axis=0) * prevm_ref[...]
  x_next = pltpu.roll(x, shift=n_rows - 1, axis=0) * nextm_ref[...]
  x = (jnp.dot(x_prev, conv_w_ref[0], preferred_element_type=jnp.float32)
       + jnp.dot(x, conv_w_ref[1], preferred_element_type=jnp.float32)
       + jnp.dot(x_next, conv_w_ref[2], preferred_element_type=jnp.float32))

  # TODO(synk): or1 / dt1 / dt2 / dt3 (vanilla_transformer_block, DWFormerBlock)
  # and PositionalEncoding were not provided; treated as identity here.

  # ---- ln2 then ln3 (kept separate to preserve reference structure) ----------
  x = layer_norm(x, ln2_g_ref[...], ln2_b_ref[...])
  x = layer_norm(x, ln3_g_ref[...], ln3_b_ref[...])

  # ---- EfficientAttention (sr_ratio=1, qkv_bias=False) -----------------------
  # Fused QKV matmul; all heads and all stacked batch elements computed at once
  # via precomputed head-block / replication / collapse matrices and an additive
  # score bias that blocks cross-element attention.  1/sqrt(D) is folded into
  # the q columns of wqkv at weight-prep time.
  qkv = jnp.dot(x, wqkv_ref[...], preferred_element_type=jnp.float32)   # (N, 3Cp)
  q = qkv[:, :c_pad]
  k = qkv[:, c_pad:2 * c_pad]
  v = qkv[:, 2 * c_pad:]

  q_rep = jnp.dot(rep_ref[...], q, preferred_element_type=jnp.float32)  # (R, Cp)
  scores = jax.lax.dot_general(
      q_rep * head_mask_ref[...], k, (((1,), (1,)), ((), ())),
      preferred_element_type=jnp.float32) + bias_ref[...]               # (R, N)
  m = jnp.max(scores, axis=-1, keepdims=True)
  e = jnp.exp(scores - m)
  denom = jnp.sum(e, axis=-1, keepdims=True)
  attn = e * pl.reciprocal(denom, approx=True)
  o_big = jnp.dot(attn, v, preferred_element_type=jnp.float32)          # (R, Cp)
  o = jnp.dot(sel_ref[...], o_big * head_mask_ref[...],
              preferred_element_type=jnp.float32)                       # (N, Cp)
  y = jnp.dot(o, wp_ref[...], preferred_element_type=jnp.float32) + bp_ref[...]

  # ---- classifier: per-element time mean-pool + batched 3-layer MLP ----------
  # (eval mode: dropout = identity).  Pool is a precomputed (Bb, N) operator.
  pooled = jnp.dot(pool_ref[...], y, preferred_element_type=jnp.float32)  # (Bb, Cp)
  h = jnp.maximum(
      jnp.dot(pooled, w1_ref[...], preferred_element_type=jnp.float32) + b1_ref[...],
      0.0)
  h = jnp.maximum(
      jnp.dot(h, w2_ref[...], preferred_element_type=jnp.float32) + b2_ref[...],
      0.0)
  logits = jnp.dot(h, w3_ref[...], preferred_element_type=jnp.float32) + b3_ref[...]
  out_ref[0] = logits.astype(out_ref.dtype)                               # (Bb, P)


# ---------------------------------------------------------------------------
# Wrapper
# ---------------------------------------------------------------------------

def _pad2d(a, rows, cols):
  r, c = a.shape
  return jnp.pad(a, ((0, rows - r), (0, cols - c)))


def dwformer_forward(params, x, x_mask, num_heads):
  del x_mask  # reference model only consumes its shape (sr_ratio == 1 path)
  B, T, C = x.shape
  classnum = params["fc3_w"].shape[0]
  Cp, P = _CPAD, _PPAD
  H = num_heads
  D = C // H
  scale = float(D) ** -0.5

  # Grid: 2 parallel steps when possible (keeps both v7x TensorCores busy); each
  # step processes a stacked slab of Bb = B // G elements so the row-parallel
  # matmuls see M = Bb*T rows.  (On 1-TC parts the 2 steps are a short loop.)
  G = 2 if (B >= 2 and B % 2 == 0) else 1
  Bb = B // G
  N = Bb * T          # slab rows per grid step
  R = Bb * H * T      # expanded (batch, head, time) attention rows

  # ---- activations: zero-pad channels to 128 lanes, flatten (B, T) ----------
  x2 = jnp.pad(x, ((0, 0), (0, 0), (0, Cp - C))).reshape(B * T, Cp)

  # ---- grid-invariant masks (hoisted out of the kernel) ----------------------
  t_of_n = jnp.arange(N) % T
  b_of_n = jnp.arange(N) // T
  t_of_r = jnp.arange(R) % T
  h_of_r = (jnp.arange(R) // T) % H
  b_of_r = jnp.arange(R) // (H * T)
  c_idx = jnp.arange(Cp)

  cmask = (c_idx < C).astype(jnp.float32)[None, :]                        # (1, Cp)
  prev_mask = (t_of_n > 0).astype(jnp.float32)[:, None]                   # (N, 1)
  next_mask = (t_of_n < T - 1).astype(jnp.float32)[:, None]               # (N, 1)
  head_mask = (((c_idx[None, :] // D) == h_of_r[:, None])
               & (c_idx[None, :] < C)).astype(jnp.float32)                # (R, Cp)
  same_b = b_of_r[:, None] == b_of_n[None, :]
  rep = (same_b & (t_of_r[:, None] == t_of_n[None, :])).astype(jnp.float32)   # (R, N)
  score_bias = jnp.where(same_b, 0.0, -1e30).astype(jnp.float32)              # (R, N)
  sel = ((b_of_n[:, None] == b_of_r[None, :])
         & (t_of_n[:, None] == t_of_r[None, :])).astype(jnp.float32)          # (N, R)
  pool = ((jnp.arange(Bb)[:, None] == b_of_n[None, :]).astype(jnp.float32)
          / float(T))                                                         # (Bb, N)

  # ---- weights: pre-transposed, zero-padded, fused once ----------------------
  ln1_g = _pad2d(params["ln1_g"], 1, Cp); ln1_b = _pad2d(params["ln1_b"], 1, Cp)
  ln2_g = _pad2d(params["ln2_g"], 1, Cp); ln2_b = _pad2d(params["ln2_b"], 1, Cp)
  ln3_g = _pad2d(params["ln3_g"], 1, Cp); ln3_b = _pad2d(params["ln3_b"], 1, Cp)

  taps = jnp.transpose(params["dyn_w"], (2, 1, 0))            # (3, C_in, C_out)
  conv_w = jnp.pad(taps, ((0, 0), (0, Cp - C), (0, Cp - C)))  # (3, Cp, Cp)

  wq = _pad2d(params["attn_wq"].T * scale, Cp, Cp)            # scale folded into q
  wk = _pad2d(params["attn_wkv"][:C, :].T, Cp, Cp)
  wv = _pad2d(params["attn_wkv"][C:, :].T, Cp, Cp)
  wqkv = jnp.concatenate([wq, wk, wv], axis=1)                # (Cp, 3*Cp)
  wp = _pad2d(params["attn_wproj"].T, Cp, Cp)
  bp = _pad2d(params["attn_bproj"], 1, Cp)

  w1 = _pad2d(params["fc1_w"].T, Cp, P); b1 = _pad2d(params["fc1_b"], 1, P)
  w2 = _pad2d(params["fc2_w"].T, P, P);  b2 = _pad2d(params["fc2_b"], 1, P)
  w3 = _pad2d(params["fc3_w"].T, P, P);  b3 = _pad2d(params["fc3_b"], 1, P)

  kern = functools.partial(_dwformer_fused_kernel, c_actual=C, c_pad=Cp)

  def full(shape):
    return pl.BlockSpec(shape, lambda g, _n=len(shape): (0,) * _n)

  out_padded = pl.pallas_call(
      kern,
      out_shape=jax.ShapeDtypeStruct((G, Bb, P), jnp.float32),
      grid=(G,),
      in_specs=[
          pl.BlockSpec((N, Cp), lambda g: (g, 0)),            # x slab
          full((1, Cp)),                                      # channel mask
          full((1, Cp)), full((1, Cp)),                       # ln1 gamma / beta
          full((1, Cp)), full((1, Cp)),                       # ln2
          full((1, Cp)), full((1, Cp)),                       # ln3
          full((N, 1)), full((N, 1)),                         # conv boundary masks
          full((3, Cp, Cp)),                                  # conv taps
          full((Cp, 3 * Cp)),                                 # fused QKV weight
          full((R, Cp)),                                      # head-block mask
          full((R, N)), full((R, N)),                         # rep, score bias
          full((N, R)),                                       # head-collapse sel
          full((Cp, Cp)), full((1, Cp)),                      # proj w / b
          full((Bb, N)),                                      # time mean-pool
          full((Cp, P)), full((1, P)),                        # fc1
          full((P, P)), full((1, P)),                         # fc2
          full((P, P)), full((1, P)),                         # fc3
      ],
      out_specs=pl.BlockSpec((1, Bb, P), lambda g: (g, 0, 0)),
      compiler_params=pltpu.CompilerParams(
          dimension_semantics=("parallel",)),
  )(x2, cmask,
    ln1_g, ln1_b, ln2_g, ln2_b, ln3_g, ln3_b,
    prev_mask, next_mask, conv_w,
    wqkv, head_mask, rep, score_bias, sel, wp, bp,
    pool, w1, b1, w2, b2, w3, b3)

  return out_padded.reshape(B, P)[:, :classnum]


# ---------------------------------------------------------------------------
# Parameter construction (deterministic, synthetic)
# ---------------------------------------------------------------------------

def xavier_uniform(key, shape, fan_in, fan_out):
  limit = (6.0 / (fan_in + fan_out)) ** 0.5
  return jax.random.uniform(key, shape, jnp.float32, -limit, limit)


def init_params(key, feadim, num_heads, classnum):
  del num_heads
  keys = jax.random.split(key, 16)
  C = feadim
  params = {
      # LayerNorms (1-D params are not xavier'd in _reset_parameters).
      "ln1_g": jnp.ones((1, C), jnp.float32), "ln1_b": jnp.zeros((1, C), jnp.float32),
      "ln2_g": jnp.ones((1, C), jnp.float32), "ln2_b": jnp.zeros((1, C), jnp.float32),
      "ln3_g": jnp.ones((1, C), jnp.float32), "ln3_b": jnp.zeros((1, C), jnp.float32),
      # DynamicConv kernel: (out, in, ksize) as in PyTorch.
      "dyn_w": xavier_uniform(keys[0], (C, C, 3), C * 3, C * 3),
      # EfficientAttention (qkv_bias=False).
      "attn_wq": xavier_uniform(keys[1], (C, C), C, C),
      "attn_wkv": xavier_uniform(keys[2], (2 * C, C), C, 2 * C),
      "attn_wproj": xavier_uniform(keys[3], (C, C), C, C),
      "attn_bproj": jnp.zeros((1, C), jnp.float32),
      # Classifier.
      "fc1_w": xavier_uniform(keys[4], (C // 2, C), C, C // 2),
      "fc1_b": jnp.zeros((1, C // 2), jnp.float32),
      "fc2_w": xavier_uniform(keys[5], (C // 4, C // 2), C // 2, C // 4),
      "fc2_b": jnp.zeros((1, C // 4), jnp.float32),
      "fc3_w": xavier_uniform(keys[6], (classnum, C // 4), C // 4, classnum),
      "fc3_b": jnp.zeros((1, classnum), jnp.float32),
  }
  return params


# ---------------------------------------------------------------------------
# Main
# ---------------------------------------------------------------------------

if __name__ == "__main__":
  # Small shapes consistent with the module's forward: (B, T, C).
  B, T = 2, 16
  feadim = 64          # EfficientAttention dim tied to feadim for consistency.
  num_heads = 8
  classnum = 4

  key = jax.random.PRNGKey(0)
  k_x, k_p = jax.random.split(key)
  x = jax.random.normal(k_x, (B, T, feadim), jnp.float32)
  x_mask = jnp.ones((B, T), jnp.float32)   # only shape-consumed in reference

  params = init_params(k_p, feadim, num_heads, classnum)

  out = dwformer_forward(params, x, x_mask, num_heads)
  out = jax.block_until_ready(out)
  assert out.shape == (B, classnum)
  print("KERNEL_OK")
</pallas_src>

<mosaic_0001>
module attributes {stable_mosaic.version = 11 : i64} {
  func.func @_dwformer_fused_kernel(%arg0: i32, %arg1: memref<16x128xf32, #tpu.memory_space<vmem>>, %arg2: memref<1x128xf32, #tpu.memory_space<vmem>>, %arg3: memref<1x128xf32, #tpu.memory_space<vmem>>, %arg4: memref<1x128xf32, #tpu.memory_space<vmem>>, %arg5: memref<1x128xf32, #tpu.memory_space<vmem>>, %arg6: memref<1x128xf32, #tpu.memory_space<vmem>>, %arg7: memref<1x128xf32, #tpu.memory_space<vmem>>, %arg8: memref<1x128xf32, #tpu.memory_space<vmem>>, %arg9: memref<16x1xf32, #tpu.memory_space<vmem>>, %arg10: memref<16x1xf32, #tpu.memory_space<vmem>>, %arg11: memref<3x128x128xf32, #tpu.memory_space<vmem>>, %arg12: memref<128x384xf32, #tpu.memory_space<vmem>>, %arg13: memref<128x128xf32, #tpu.memory_space<vmem>>, %arg14: memref<128x16xf32, #tpu.memory_space<vmem>>, %arg15: memref<128x16xf32, #tpu.memory_space<vmem>>, %arg16: memref<16x128xf32, #tpu.memory_space<vmem>>, %arg17: memref<128x128xf32, #tpu.memory_space<vmem>>, %arg18: memref<1x128xf32, #tpu.memory_space<vmem>>, %arg19: memref<1x16xf32, #tpu.memory_space<vmem>>, %arg20: memref<128x128xf32, #tpu.memory_space<vmem>>, %arg21: memref<1x128xf32, #tpu.memory_space<vmem>>, %arg22: memref<128x128xf32, #tpu.memory_space<vmem>>, %arg23: memref<1x128xf32, #tpu.memory_space<vmem>>, %arg24: memref<128x128xf32, #tpu.memory_space<vmem>>, %arg25: memref<1x128xf32, #tpu.memory_space<vmem>>, %arg26: memref<1x1x128xf32, #tpu.memory_space<vmem>>) attributes {dimension_semantics = [#tpu.dimension_semantics<parallel>], iteration_bounds = array<i64: 2>, scalar_prefetch = 0 : i64, scratch_operands = 0 : i64, tpu.core_type = #tpu.core_type<tc>, window_params = [{transform_indices = @transform_0, window_bounds = array<i64: 16, 128>}, {pipeline_mode = #tpu.pipeline_mode<synchronous>, transform_indices = @transform_1, window_bounds = array<i64: 1, 128>}, {pipeline_mode = #tpu.pipeline_mode<synchronous>, transform_indices = @transform_2, window_bounds = array<i64: 1, 128>}, {pipeline_mode = #tpu.pipeline_mode<synchronous>, transform_indices = @transform_3, window_bounds = array<i64: 1, 128>}, {pipeline_mode = #tpu.pipeline_mode<synchronous>, transform_indices = @transform_4, window_bounds = array<i64: 1, 128>}, {pipeline_mode = #tpu.pipeline_mode<synchronous>, transform_indices = @transform_5, window_bounds = array<i64: 1, 128>}, {pipeline_mode = #tpu.pipeline_mode<synchronous>, transform_indices = @transform_6, window_bounds = array<i64: 1, 128>}, {pipeline_mode = #tpu.pipeline_mode<synchronous>, transform_indices = @transform_7, window_bounds = array<i64: 1, 128>}, {pipeline_mode = #tpu.pipeline_mode<synchronous>, transform_indices = @transform_8, window_bounds = array<i64: 16, 1>}, {pipeline_mode = #tpu.pipeline_mode<synchronous>, transform_indices = @transform_9, window_bounds = array<i64: 16, 1>}, {pipeline_mode = #tpu.pipeline_mode<synchronous>, transform_indices = @transform_10, window_bounds = array<i64: 3, 128, 128>}, {pipeline_mode = #tpu.pipeline_mode<synchronous>, transform_indices = @transform_11, window_bounds = array<i64: 128, 384>}, {pipeline_mode = #tpu.pipeline_mode<synchronous>, transform_indices = @transform_12, window_bounds = array<i64: 128, 128>}, {pipeline_mode = #tpu.pipeline_mode<synchronous>, transform_indices = @transform_13, window_bounds = array<i64: 128, 16>}, {pipeline_mode = #tpu.pipeline_mode<synchronous>, transform_indices = @transform_14, window_bounds = array<i64: 128, 16>}, {pipeline_mode = #tpu.pipeline_mode<synchronous>, transform_indices = @transform_15, window_bounds = array<i64: 16, 128>}, {pipeline_mode = #tpu.pipeline_mode<synchronous>, transform_indices = @transform_16, window_bounds = array<i64: 128, 128>}, {pipeline_mode = #tpu.pipeline_mode<synchronous>, transform_indices = @transform_17, window_bounds = array<i64: 1, 128>}, {pipeline_mode = #tpu.pipeline_mode<synchronous>, transform_indices = @transform_18, window_bounds = array<i64: 1, 16>}, {pipeline_mode = #tpu.pipeline_mode<synchronous>, transform_indices = @transform_19, window_bounds = array<i64: 128, 128>}, {pipeline_mode = #tpu.pipeline_mode<synchronous>, transform_indices = @transform_20, window_bounds = array<i64: 1, 128>}, {pipeline_mode = #tpu.pipeline_mode<synchronous>, transform_indices = @transform_21, window_bounds = array<i64: 128, 128>}, {pipeline_mode = #tpu.pipeline_mode<synchronous>, transform_indices = @transform_22, window_bounds = array<i64: 1, 128>}, {pipeline_mode = #tpu.pipeline_mode<synchronous>, transform_indices = @transform_23, window_bounds = array<i64: 128, 128>}, {pipeline_mode = #tpu.pipeline_mode<synchronous>, transform_indices = @transform_24, window_bounds = array<i64: 1, 128>}, {transform_indices = @transform_25, window_bounds = array<i64: 1, 1, 128>}]} {
    %c0 = arith.constant 0 : index
    %c0_0 = arith.constant 0 : index
    %0 = vector.load %arg1[%c0, %c0_0] : memref<16x128xf32, #tpu.memory_space<vmem>>, vector<16x128xf32>
    %c0_1 = arith.constant 0 : index
    %c0_2 = arith.constant 0 : index
    %1 = vector.load %arg2[%c0_1, %c0_2] : memref<1x128xf32, #tpu.memory_space<vmem>>, vector<1x128xf32>
    %c0_3 = arith.constant 0 : index
    %c0_4 = arith.constant 0 : index
    %2 = vector.load %arg3[%c0_3, %c0_4] : memref<1x128xf32, #tpu.memory_space<vmem>>, vector<1x128xf32>
    %c0_5 = arith.constant 0 : index
    %c0_6 = arith.constant 0 : index
    %3 = vector.load %arg4[%c0_5, %c0_6] : memref<1x128xf32, #tpu.memory_space<vmem>>, vector<1x128xf32>
    %cst = arith.constant dense<0.000000e+00> : vector<16xf32>
    %4 = vector.multi_reduction <add>, %0, %cst [1] : vector<16x128xf32> to vector<16xf32>
    %5 = vector.shape_cast %4 : vector<16xf32> to vector<16x1xf32>
    %cst_7 = arith.constant 1.562500e-02 : f32
    %6 = vector.broadcast %cst_7 : f32 to vector<16x1xf32>
    %7 = arith.mulf %5, %6 : vector<16x1xf32>
    %8 = vector.broadcast %7 : vector<16x1xf32> to vector<16x128xf32>
    %9 = arith.subf %0, %8 : vector<16x128xf32>
    %10 = vector.broadcast %1 : vector<1x128xf32> to vector<16x128xf32>
    %11 = arith.mulf %9, %10 : vector<16x128xf32>
    %12 = arith.mulf %11, %11 : vector<16x128xf32>
    %cst_8 = arith.constant dense<0.000000e+00> : vector<16xf32>
    %13 = vector.multi_reduction <add>, %12, %cst_8 [1] : vector<16x128xf32> to vector<16xf32>
    %14 = vector.shape_cast %13 : vector<16xf32> to vector<16x1xf32>
    %cst_9 = arith.constant 1.562500e-02 : f32
    %15 = vector.broadcast %cst_9 : f32 to vector<16x1xf32>
    %16 = arith.mulf %14, %15 : vector<16x1xf32>
    %cst_10 = arith.constant 9.99999974E-6 : f32
    %17 = vector.broadcast %cst_10 : f32 to vector<16x1xf32>
    %18 = arith.addf %16, %17 : vector<16x1xf32>
    %19 = math.rsqrt %18 : vector<16x1xf32>
    %20 = vector.broadcast %19 : vector<16x1xf32> to vector<16x128xf32>
    %21 = arith.mulf %11, %20 : vector<16x128xf32>
    %22 = vector.broadcast %2 : vector<1x128xf32> to vector<16x128xf32>
    %23 = arith.mulf %21, %22 : vector<16x128xf32>
    %24 = vector.broadcast %3 : vector<1x128xf32> to vector<16x128xf32>
    %25 = arith.addf %23, %24 : vector<16x128xf32>
    %c1_i32 = arith.constant 1 : i32
    %26 = tpu.dynamic_rotate %25 by %c1_i32 dim 0 : vector<16x128xf32>, i32 -> vector<16x128xf32>
    %c0_11 = arith.constant 0 : index
    %c0_12 = arith.constant 0 : index
    %27 = vector.load %arg9[%c0_11, %c0_12] : memref<16x1xf32, #tpu.memory_space<vmem>>, vector<16x1xf32>
    %28 = vector.broadcast %27 : vector<16x1xf32> to vector<16x128xf32>
    %29 = arith.mulf %26, %28 : vector<16x128xf32>
    %c15_i32 = arith.constant 15 : i32
    %30 = tpu.dynamic_rotate %25 by %c15_i32 dim 0 : vector<16x128xf32>, i32 -> vector<16x128xf32>
    %c0_13 = arith.constant 0 : index
    %c0_14 = arith.constant 0 : index
    %31 = vector.load %arg10[%c0_13, %c0_14] : memref<16x1xf32, #tpu.memory_space<vmem>>, vector<16x1xf32>
    %32 = vector.broadcast %31 : vector<16x1xf32> to vector<16x128xf32>
    %33 = arith.mulf %30, %32 : vector<16x128xf32>
    %c0_15 = arith.constant 0 : index
    %c0_16 = arith.constant 0 : index
    %c0_17 = arith.constant 0 : index
    %34 = vector.load %arg11[%c0_15, %c0_16, %c0_17] : memref<3x128x128xf32, #tpu.memory_space<vmem>>, vector<1x128x128xf32>
    %35 = vector.shape_cast %34 : vector<1x128x128xf32> to vector<128x128xf32>
    %cst_18 = arith.constant dense<0.000000e+00> : vector<16x128xf32>
    %36 = tpu.matmul %29, %35, %cst_18 {dimension_numbers = #tpu.dot_dimension_numbers<[1], [0], [0], [1], [0, 0, 1, 1], [], []>} : vector<16x128xf32>, vector<128x128xf32>, vector<16x128xf32> -> vector<16x128xf32>
    %c1 = arith.constant 1 : index
    %c0_19 = arith.constant 0 : index
    %c0_20 = arith.constant 0 : index
    %37 = vector.load %arg11[%c1, %c0_19, %c0_20] : memref<3x128x128xf32, #tpu.memory_space<vmem>>, vector<1x128x128xf32>
    %38 = vector.shape_cast %37 : vector<1x128x128xf32> to vector<128x128xf32>
    %cst_21 = arith.constant dense<0.000000e+00> : vector<16x128xf32>
    %39 = tpu.matmul %25, %38, %cst_21 {dimension_numbers = #tpu.dot_dimension_numbers<[1], [0], [0], [1], [0, 0, 1, 1], [], []>} : vector<16x128xf32>, vector<128x128xf32>, vector<16x128xf32> -> vector<16x128xf32>
    %40 = arith.addf %36, %39 : vector<16x128xf32>
    %c2 = arith.constant 2 : index
    %c0_22 = arith.constant 0 : index
    %c0_23 = arith.constant 0 : index
    %41 = vector.load %arg11[%c2, %c0_22, %c0_23] : memref<3x128x128xf32, #tpu.memory_space<vmem>>, vector<1x128x128xf32>
    %42 = vector.shape_cast %41 : vector<1x128x128xf32> to vector<128x128xf32>
    %cst_24 = arith.constant dense<0.000000e+00> : vector<16x128xf32>
    %43 = tpu.matmul %33, %42, %cst_24 {dimension_numbers = #tpu.dot_dimension_numbers<[1], [0], [0], [1], [0, 0, 1, 1], [], []>} : vector<16x128xf32>, vector<128x128xf32>, vector<16x128xf32> -> vector<16x128xf32>
    %44 = arith.addf %40, %43 : vector<16x128xf32>
    %c0_25 = arith.constant 0 : index
    %c0_26 = arith.constant 0 : index
    %45 = vector.load %arg5[%c0_25, %c0_26] : memref<1x128xf32, #tpu.memory_space<vmem>>, vector<1x128xf32>
    %c0_27 = arith.constant 0 : index
    %c0_28 = arith.constant 0 : index
    %46 = vector.load %arg6[%c0_27, %c0_28] : memref<1x128xf32, #tpu.memory_space<vmem>>, vector<1x128xf32>
    %cst_29 = arith.constant dense<0.000000e+00> : vector<16xf32>
    %47 = vector.multi_reduction <add>, %44, %cst_29 [1] : vector<16x128xf32> to vector<16xf32>
    %48 = vector.shape_cast %47 : vector<16xf32> to vector<16x1xf32>
    %cst_30 = arith.constant 1.562500e-02 : f32
    %49 = vector.broadcast %cst_30 : f32 to vector<16x1xf32>
    %50 = arith.mulf %48, %49 : vector<16x1xf32>
    %51 = vector.broadcast %50 : vector<16x1xf32> to vector<16x128xf32>
    %52 = arith.subf %44, %51 : vector<16x128xf32>
    %53 = vector.broadcast %1 : vector<1x128xf32> to vector<16x128xf32>
    %54 = arith.mulf %52, %53 : vector<16x128xf32>
    %55 = arith.mulf %54, %54 : vector<16x128xf32>
    %cst_31 = arith.constant dense<0.000000e+00> : vector<16xf32>
    %56 = vector.multi_reduction <add>, %55, %cst_31 [1] : vector<16x128xf32> to vector<16xf32>
    %57 = vector.shape_cast %56 : vector<16xf32> to vector<16x1xf32>
    %cst_32 = arith.constant 1.562500e-02 : f32
    %58 = vector.broadcast %cst_32 : f32 to vector<16x1xf32>
    %59 = arith.mulf %57, %58 : vector<16x1xf32>
    %cst_33 = arith.constant 9.99999974E-6 : f32
    %60 = vector.broadcast %cst_33 : f32 to vector<16x1xf32>
    %61 = arith.addf %59, %60 : vector<16x1xf32>
    %62 = math.rsqrt %61 : vector<16x1xf32>
    %63 = vector.broadcast %62 : vector<16x1xf32> to vector<16x128xf32>
    %64 = arith.mulf %54, %63 : vector<16x128xf32>
    %65 = vector.broadcast %45 : vector<1x128xf32> to vector<16x128xf32>
    %66 = arith.mulf %64, %65 : vector<16x128xf32>
    %67 = vector.broadcast %46 : vector<1x128xf32> to vector<16x128xf32>
    %68 = arith.addf %66, %67 : vector<16x128xf32>
    %c0_34 = arith.constant 0 : index
    %c0_35 = arith.constant 0 : index
    %69 = vector.load %arg7[%c0_34, %c0_35] : memref<1x128xf32, #tpu.memory_space<vmem>>, vector<1x128xf32>
    %c0_36 = arith.constant 0 : index
    %c0_37 = arith.constant 0 : index
    %70 = vector.load %arg8[%c0_36, %c0_37] : memref<1x128xf32, #tpu.memory_space<vmem>>, vector<1x128xf32>
    %cst_38 = arith.constant dense<0.000000e+00> : vector<16xf32>
    %71 = vector.multi_reduction <add>, %68, %cst_38 [1] : vector<16x128xf32> to vector<16xf32>
    %72 = vector.shape_cast %71 : vector<16xf32> to vector<16x1xf32>
    %cst_39 = arith.constant 1.562500e-02 : f32
    %73 = vector.broadcast %cst_39 : f32 to vector<16x1xf32>
    %74 = arith.mulf %72, %73 : vector<16x1xf32>
    %75 = vector.broadcast %74 : vector<16x1xf32> to vector<16x128xf32>
    %76 = arith.subf %68, %75 : vector<16x128xf32>
    %77 = vector.broadcast %1 : vector<1x128xf32> to vector<16x128xf32>
    %78 = arith.mulf %76, %77 : vector<16x128xf32>
    %79 = arith.mulf %78, %78 : vector<16x128xf32>
    %cst_40 = arith.constant dense<0.000000e+00> : vector<16xf32>
    %80 = vector.multi_reduction <add>, %79, %cst_40 [1] : vector<16x128xf32> to vector<16xf32>
    %81 = vector.shape_cast %80 : vector<16xf32> to vector<16x1xf32>
    %cst_41 = arith.constant 1.562500e-02 : f32
    %82 = vector.broadcast %cst_41 : f32 to vector<16x1xf32>
    %83 = arith.mulf %81, %82 : vector<16x1xf32>
    %cst_42 = arith.constant 9.99999974E-6 : f32
    %84 = vector.broadcast %cst_42 : f32 to vector<16x1xf32>
    %85 = arith.addf %83, %84 : vector<16x1xf32>
    %86 = math.rsqrt %85 : vector<16x1xf32>
    %87 = vector.broadcast %86 : vector<16x1xf32> to vector<16x128xf32>
    %88 = arith.mulf %78, %87 : vector<16x128xf32>
    %89 = vector.broadcast %69 : vector<1x128xf32> to vector<16x128xf32>
    %90 = arith.mulf %88, %89 : vector<16x128xf32>
    %91 = vector.broadcast %70 : vector<1x128xf32> to vector<16x128xf32>
    %92 = arith.addf %90, %91 : vector<16x128xf32>
    %c0_43 = arith.constant 0 : index
    %c0_44 = arith.constant 0 : index
    %93 = vector.load %arg12[%c0_43, %c0_44] : memref<128x384xf32, #tpu.memory_space<vmem>>, vector<128x384xf32>
    %cst_45 = arith.constant dense<0.000000e+00> : vector<16x384xf32>
    %94 = tpu.matmul %92, %93, %cst_45 {dimension_numbers = #tpu.dot_dimension_numbers<[1], [0], [0], [1], [0, 0, 1, 1], [], []>} : vector<16x128xf32>, vector<128x384xf32>, vector<16x384xf32> -> vector<16x384xf32>
    %95 = vector.extract_strided_slice %94 {offsets = [0, 0], sizes = [16, 128], strides = [1, 1]} : vector<16x384xf32> to vector<16x128xf32>
    %96 = vector.extract_strided_slice %94 {offsets = [0, 128], sizes = [16, 128], strides = [1, 1]} : vector<16x384xf32> to vector<16x128xf32>
    %97 = vector.extract_strided_slice %94 {offsets = [0, 256], sizes = [16, 128], strides = [1, 1]} : vector<16x384xf32> to vector<16x128xf32>
    %c0_46 = arith.constant 0 : index
    %c0_47 = arith.constant 0 : index
    %98 = vector.load %arg14[%c0_46, %c0_47] : memref<128x16xf32, #tpu.memory_space<vmem>>, vector<128x16xf32>
    %cst_48 = arith.constant dense<0.000000e+00> : vector<128x128xf32>
    %99 = tpu.matmul %98, %95, %cst_48 {dimension_numbers = #tpu.dot_dimension_numbers<[1], [0], [0], [1], [0, 0, 1, 1], [], []>} : vector<128x16xf32>, vector<16x128xf32>, vector<128x128xf32> -> vector<128x128xf32>
    %c0_49 = arith.constant 0 : index
    %c0_50 = arith.constant 0 : index
    %100 = vector.load %arg13[%c0_49, %c0_50] : memref<128x128xf32, #tpu.memory_space<vmem>>, vector<128x128xf32>
    %101 = arith.mulf %99, %100 : vector<128x128xf32>
    %cst_51 = arith.constant dense<0.000000e+00> : vector<128x16xf32>
    %102 = tpu.matmul %101, %96, %cst_51 {dimension_numbers = #tpu.dot_dimension_numbers<[1], [1], [0], [0], [0, 0, 1, 0], [], []>} : vector<128x128xf32>, vector<16x128xf32>, vector<128x16xf32> -> vector<128x16xf32>
    %c0_52 = arith.constant 0 : index
    %c0_53 = arith.constant 0 : index
    %103 = vector.load %arg15[%c0_52, %c0_53] : memref<128x16xf32, #tpu.memory_space<vmem>>, vector<128x16xf32>
    %104 = arith.addf %102, %103 : vector<128x16xf32>
    %cst_54 = arith.constant dense<0xFF800000> : vector<128xf32>
    %105 = vector.multi_reduction <maximumf>, %104, %cst_54 [1] : vector<128x16xf32> to vector<128xf32>
    %106 = vector.shape_cast %105 : vector<128xf32> to vector<128x1xf32>
    %107 = vector.broadcast %106 : vector<128x1xf32> to vector<128x16xf32>
    %108 = arith.subf %104, %107 : vector<128x16xf32>
    %109 = math.exp %108 : vector<128x16xf32>
    %cst_55 = arith.constant dense<0.000000e+00> : vector<128xf32>
    %110 = vector.multi_reduction <add>, %109, %cst_55 [1] : vector<128x16xf32> to vector<128xf32>
    %111 = vector.shape_cast %110 : vector<128xf32> to vector<128x1xf32>
    %112 = tpu.reciprocal %111 {approx = true} : vector<128x1xf32> -> vector<128x1xf32>
    %113 = vector.broadcast %112 : vector<128x1xf32> to vector<128x16xf32>
    %114 = arith.mulf %109, %113 : vector<128x16xf32>
    %cst_56 = arith.constant dense<0.000000e+00> : vector<128x128xf32>
    %115 = tpu.matmul %114, %97, %cst_56 {dimension_numbers = #tpu.dot_dimension_numbers<[1], [0], [0], [1], [0, 0, 1, 1], [], []>} : vector<128x16xf32>, vector<16x128xf32>, vector<128x128xf32> -> vector<128x128xf32>
    %c0_57 = arith.constant 0 : index
    %c0_58 = arith.constant 0 : index
    %116 = vector.load %arg16[%c0_57, %c0_58] : memref<16x128xf32, #tpu.memory_space<vmem>>, vector<16x128xf32>
    %c0_59 = arith.constant 0 : index
    %c0_60 = arith.constant 0 : index
    %117 = vector.load %arg13[%c0_59, %c0_60] : memref<128x128xf32, #tpu.memory_space<vmem>>, vector<128x128xf32>
    %118 = arith.mulf %115, %117 : vector<128x128xf32>
    %cst_61 = arith.constant dense<0.000000e+00> : vector<16x128xf32>
    %119 = tpu.matmul %116, %118, %cst_61 {dimension_numbers = #tpu.dot_dimension_numbers<[1], [0], [0], [1], [0, 0, 1, 1], [], []>} : vector<16x128xf32>, vector<128x128xf32>, vector<16x128xf32> -> vector<16x128xf32>
    %c0_62 = arith.constant 0 : index
    %c0_63 = arith.constant 0 : index
    %120 = vector.load %arg17[%c0_62, %c0_63] : memref<128x128xf32, #tpu.memory_space<vmem>>, vector<128x128xf32>
    %cst_64 = arith.constant dense<0.000000e+00> : vector<16x128xf32>
    %121 = tpu.matmul %119, %120, %cst_64 {dimension_numbers = #tpu.dot_dimension_numbers<[1], [0], [0], [1], [0, 0, 1, 1], [], []>} : vector<16x128xf32>, vector<128x128xf32>, vector<16x128xf32> -> vector<16x128xf32>
    %c0_65 = arith.constant 0 : index
    %c0_66 = arith.constant 0 : index
    %122 = vector.load %arg18[%c0_65, %c0_66] : memref<1x128xf32, #tpu.memory_space<vmem>>, vector<1x128xf32>
    %123 = vector.broadcast %122 : vector<1x128xf32> to vector<16x128xf32>
    %124 = arith.addf %121, %123 : vector<16x128xf32>
    %c0_67 = arith.constant 0 : index
    %c0_68 = arith.constant 0 : index
    %125 = vector.load %arg19[%c0_67, %c0_68] : memref<1x16xf32, #tpu.memory_space<vmem>>, vector<1x16xf32>
    %cst_69 = arith.constant dense<0.000000e+00> : vector<1x128xf32>
    %126 = tpu.matmul %125, %124, %cst_69 {dimension_numbers = #tpu.dot_dimension_numbers<[1], [0], [0], [1], [0, 0, 1, 1], [], []>} : vector<1x16xf32>, vector<16x128xf32>, vector<1x128xf32> -> vector<1x128xf32>
    %c0_70 = arith.constant 0 : index
    %c0_71 = arith.constant 0 : index
    %127 = vector.load %arg20[%c0_70, %c0_71] : memref<128x128xf32, #tpu.memory_space<vmem>>, vector<128x128xf32>
    %cst_72 = arith.constant dense<0.000000e+00> : vector<1x128xf32>
    %128 = tpu.matmul %126, %127, %cst_72 {dimension_numbers = #tpu.dot_dimension_numbers<[1], [0], [0], [1], [0, 0, 1, 1], [], []>} : vector<1x128xf32>, vector<128x128xf32>, vector<1x128xf32> -> vector<1x128xf32>
    %c0_73 = arith.constant 0 : index
    %c0_74 = arith.constant 0 : index
    %129 = vector.load %arg21[%c0_73, %c0_74] : memref<1x128xf32, #tpu.memory_space<vmem>>, vector<1x128xf32>
    %130 = arith.addf %128, %129 : vector<1x128xf32>
    %cst_75 = arith.constant 0.000000e+00 : f32
    %131 = vector.broadcast %cst_75 : f32 to vector<1x128xf32>
    %132 = arith.maximumf %130, %131 : vector<1x128xf32>
    %c0_76 = arith.constant 0 : index
    %c0_77 = arith.constant 0 : index
    %133 = vector.load %arg22[%c0_76, %c0_77] : memref<128x128xf32, #tpu.memory_space<vmem>>, vector<128x128xf32>
    %cst_78 = arith.constant dense<0.000000e+00> : vector<1x128xf32>
    %134 = tpu.matmul %132, %133, %cst_78 {dimension_numbers = #tpu.dot_dimension_numbers<[1], [0], [0], [1], [0, 0, 1, 1], [], []>} : vector<1x128xf32>, vector<128x128xf32>, vector<1x128xf32> -> vector<1x128xf32>
    %c0_79 = arith.constant 0 : index
    %c0_80 = arith.constant 0 : index
    %135 = vector.load %arg23[%c0_79, %c0_80] : memref<1x128xf32, #tpu.memory_space<vmem>>, vector<1x128xf32>
    %136 = arith.addf %134, %135 : vector<1x128xf32>
    %cst_81 = arith.constant 0.000000e+00 : f32
    %137 = vector.broadcast %cst_81 : f32 to vector<1x128xf32>
    %138 = arith.maximumf %136, %137 : vector<1x128xf32>
    %c0_82 = arith.constant 0 : index
    %c0_83 = arith.constant 0 : index
    %139 = vector.load %arg24[%c0_82, %c0_83] : memref<128x128xf32, #tpu.memory_space<vmem>>, vector<128x128xf32>
    %cst_84 = arith.constant dense<0.000000e+00> : vector<1x128xf32>
    %140 = tpu.matmul %138, %139, %cst_84 {dimension_numbers = #tpu.dot_dimension_numbers<[1], [0], [0], [1], [0, 0, 1, 1], [], []>} : vector<1x128xf32>, vector<128x128xf32>, vector<1x128xf32> -> vector<1x128xf32>
    %c0_85 = arith.constant 0 : index
    %c0_86 = arith.constant 0 : index
    %141 = vector.load %arg25[%c0_85, %c0_86] : memref<1x128xf32, #tpu.memory_space<vmem>>, vector<1x128xf32>
    %142 = arith.addf %140, %141 : vector<1x128xf32>
    %c0_87 = arith.constant 0 : index
    %c0_88 = arith.constant 0 : index
    %c0_89 = arith.constant 0 : index
    %143 = vector.load %arg26[%c0_87, %c0_88, %c0_89] : memref<1x1x128xf32, #tpu.memory_space<vmem>>, vector<1x1x128xf32>
    %144 = vector.shape_cast %143 : vector<1x1x128xf32> to vector<1x128xf32>
    %145 = vector.shape_cast %142 : vector<1x128xf32> to vector<1x1x128xf32>
    tpu.vector_store %arg26[%c0_87, %c0_88, %c0_89], %145 {strides = array<i32>} : memref<1x1x128xf32, #tpu.memory_space<vmem>>, vector<1x1x128xf32>,
    return
  }
  func.func @transform_0(%arg0: i32) -> (i32, i32) {
    %c0_i32 = arith.constant 0 : i32
    %c0_i32_0 = arith.constant 0 : i32
    return %arg0, %c0_i32 : i32, i32
  }
  func.func @transform_1(%arg0: i32) -> (i32, i32) {
    %c0_i32 = arith.constant 0 : i32
    %c0_i32_0 = arith.constant 0 : i32
    %c0_i32_1 = arith.constant 0 : i32
    return %c0_i32, %c0_i32_0 : i32, i32
  }
  func.func @transform_2(%arg0: i32) -> (i32, i32) {
    %c0_i32 = arith.constant 0 : i32
    %c0_i32_0 = arith.constant 0 : i32
    %c0_i32_1 = arith.constant 0 : i32
    return %c0_i32, %c0_i32_0 : i32, i32
  }
  func.func @transform_3(%arg0: i32) -> (i32, i32) {
    %c0_i32 = arith.constant 0 : i32
    %c0_i32_0 = arith.constant 0 : i32
    %c0_i32_1 = arith.constant 0 : i32
    return %c0_i32, %c0_i32_0 : i32, i32
  }
  func.func @transform_4(%arg0: i32) -> (i32, i32) {
    %c0_i32 = arith.constant 0 : i32
    %c0_i32_0 = arith.constant 0 : i32
    %c0_i32_1 = arith.constant 0 : i32
    return %c0_i32, %c0_i32_0 : i32, i32
  }
  func.func @transform_5(%arg0: i32) -> (i32, i32) {
    %c0_i32 = arith.constant 0 : i32
    %c0_i32_0 = arith.constant 0 : i32
    %c0_i32_1 = arith.constant 0 : i32
    return %c0_i32, %c0_i32_0 : i32, i32
  }
  func.func @transform_6(%arg0: i32) -> (i32, i32) {
    %c0_i32 = arith.constant 0 : i32
    %c0_i32_0 = arith.constant 0 : i32
    %c0_i32_1 = arith.constant 0 : i32
    return %c0_i32, %c0_i32_0 : i32, i32
  }
  func.func @transform_7(%arg0: i32) -> (i32, i32) {
    %c0_i32 = arith.constant 0 : i32
    %c0_i32_0 = arith.constant 0 : i32
    %c0_i32_1 = arith.constant 0 : i32
    return %c0_i32, %c0_i32_0 : i32, i32
  }
  func.func @transform_8(%arg0: i32) -> (i32, i32) {
    %c0_i32 = arith.constant 0 : i32
    %c0_i32_0 = arith.constant 0 : i32
    %c0_i32_1 = arith.constant 0 : i32
    return %c0_i32, %c0_i32_0 : i32, i32
  }
  func.func @transform_9(%arg0: i32) -> (i32, i32) {
    %c0_i32 = arith.constant 0 : i32
    %c0_i32_0 = arith.constant 0 : i32
    %c0_i32_1 = arith.constant 0 : i32
    return %c0_i32, %c0_i32_0 : i32, i32
  }
  func.func @transform_10(%arg0: i32) -> (i32, i32, i32) {
    %c0_i32 = arith.constant 0 : i32
    %c0_i32_0 = arith.constant 0 : i32
    %c0_i32_1 = arith.constant 0 : i32
    %c0_i32_2 = arith.constant 0 : i32
    return %c0_i32, %c0_i32_0, %c0_i32_1 : i32, i32, i32
  }
  func.func @transform_11(%arg0: i32) -> (i32, i32) {
    %c0_i32 = arith.constant 0 : i32
    %c0_i32_0 = arith.constant 0 : i32
    %c0_i32_1 = arith.constant 0 : i32
    return %c0_i32, %c0_i32_0 : i32, i32
  }
  func.func @transform_12(%arg0: i32) -> (i32, i32) {
    %c0_i32 = arith.constant 0 : i32
    %c0_i32_0 = arith.constant 0 : i32
    %c0_i32_1 = arith.constant 0 : i32
    return %c0_i32, %c0_i32_0 : i32, i32
  }
  func.func @transform_13(%arg0: i32) -> (i32, i32) {
    %c0_i32 = arith.constant 0 : i32
    %c0_i32_0 = arith.constant 0 : i32
    %c0_i32_1 = arith.constant 0 : i32
    return %c0_i32, %c0_i32_0 : i32, i32
  }
  func.func @transform_14(%arg0: i32) -> (i32, i32) {
    %c0_i32 = arith.constant 0 : i32
    %c0_i32_0 = arith.constant 0 : i32
    %c0_i32_1 = arith.constant 0 : i32
    return %c0_i32, %c0_i32_0 : i32, i32
  }
  func.func @transform_15(%arg0: i32) -> (i32, i32) {
    %c0_i32 = arith.constant 0 : i32
    %c0_i32_0 = arith.constant 0 : i32
    %c0_i32_1 = arith.constant 0 : i32
    return %c0_i32, %c0_i32_0 : i32, i32
  }
  func.func @transform_16(%arg0: i32) -> (i32, i32) {
    %c0_i32 = arith.constant 0 : i32
    %c0_i32_0 = arith.constant 0 : i32
    %c0_i32_1 = arith.constant 0 : i32
    return %c0_i32, %c0_i32_0 : i32, i32
  }
  func.func @transform_17(%arg0: i32) -> (i32, i32) {
    %c0_i32 = arith.constant 0 : i32
    %c0_i32_0 = arith.constant 0 : i32
    %c0_i32_1 = arith.constant 0 : i32
    return %c0_i32, %c0_i32_0 : i32, i32
  }
  func.func @transform_18(%arg0: i32) -> (i32, i32) {
    %c0_i32 = arith.constant 0 : i32
    %c0_i32_0 = arith.constant 0 : i32
    %c0_i32_1 = arith.constant 0 : i32
    return %c0_i32, %c0_i32_0 : i32, i32
  }
  func.func @transform_19(%arg0: i32) -> (i32, i32) {
    %c0_i32 = arith.constant 0 : i32
    %c0_i32_0 = arith.constant 0 : i32
    %c0_i32_1 = arith.constant 0 : i32
    return %c0_i32, %c0_i32_0 : i32, i32
  }
  func.func @transform_20(%arg0: i32) -> (i32, i32) {
    %c0_i32 = arith.constant 0 : i32
    %c0_i32_0 = arith.constant 0 : i32
    %c0_i32_1 = arith.constant 0 : i32
    return %c0_i32, %c0_i32_0 : i32, i32
  }
  func.func @transform_21(%arg0: i32) -> (i32, i32) {
    %c0_i32 = arith.constant 0 : i32
    %c0_i32_0 = arith.constant 0 : i32
    %c0_i32_1 = arith.constant 0 : i32
    return %c0_i32, %c0_i32_0 : i32, i32
  }
  func.func @transform_22(%arg0: i32) -> (i32, i32) {
    %c0_i32 = arith.constant 0 : i32
    %c0_i32_0 = arith.constant 0 : i32
    %c0_i32_1 = arith.constant 0 : i32
    return %c0_i32, %c0_i32_0 : i32, i32
  }
  func.func @transform_23(%arg0: i32) -> (i32, i32) {
    %c0_i32 = arith.constant 0 : i32
    %c0_i32_0 = arith.constant 0 : i32
    %c0_i32_1 = arith.constant 0 : i32
    return %c0_i32, %c0_i32_0 : i32, i32
  }
  func.func @transform_24(%arg0: i32) -> (i32, i32) {
    %c0_i32 = arith.constant 0 : i32
    %c0_i32_0 = arith.constant 0 : i32
    %c0_i32_1 = arith.constant 0 : i32
    return %c0_i32, %c0_i32_0 : i32, i32
  }
  func.func @transform_25(%arg0: i32) -> (i32, i32, i32) {
    %c0_i32 = arith.constant 0 : i32
    %c0_i32_0 = arith.constant 0 : i32
    %c0_i32_1 = arith.constant 0 : i32
    return %arg0, %c0_i32, %c0_i32_0 : i32, i32, i32
  }
}

</mosaic_0001>

<bundles_post_ra>
// kernel: tpu_custom_call.1
= control target key start
LH: loop header
LB: loop body
LE: loop exit
PB: predicated region body
PF: predicated region fallthrough
CT: control target
= control target key end

     0   :  { %s5700_s0 = inlined_call_operand.hbm [shape: f32[32,128], index: 0, kind: input, shape index: {}]   ;;  %s5701_s1 = inlined_call_operand.vmem [shape: f32[1,128], index: 1, kind: input, shape index: {}]   ;;  %s5702_s2 = inlined_call_operand.vmem [shape: f32[1,128], index: 2, kind: input, shape index: {}]   ;;  %s5703_s3 = inlined_call_operand.vmem [shape: f32[1,128], index: 3, kind: input, shape index: {}]   ;;  %s5704_s4 = inlined_call_operand.vmem [shape: f32[1,128], index: 4, kind: input, shape index: {}]   ;;  %s5705_s5 = inlined_call_operand.vmem [shape: f32[1,128], index: 5, kind: input, shape index: {}]   ;;  %s5706_s6 = inlined_call_operand.vmem [shape: f32[1,128], index: 6, kind: input, shape index: {}]   ;;  %s5707_s7 = inlined_call_operand.hbm [shape: f32[1,128], index: 7, kind: input, shape index: {}]   ;;  %s5708_s8 = inlined_call_operand.vmem [shape: f32[16,1], index: 8, kind: input, shape index: {}]   ;;  %s5709_s9 = inlined_call_operand.vmem [shape: f32[16,1], index: 9, kind: input, shape index: {}]   ;;  %s5710_s10 = inlined_call_operand.hbm [shape: f32[3,128,128], index: 10, kind: input, shape index: {}]   ;;  %s5711_s11 = inlined_call_operand.hbm [shape: f32[128,384], index: 11, kind: input, shape index: {}]   ;;  %s5712_s12 = inlined_call_operand.vmem [shape: f32[128,128], index: 12, kind: input, shape index: {}]   ;;  %s5713_s13 = inlined_call_operand.vmem [shape: f32[128,16], index: 13, kind: input, shape index: {}]   ;;  %s5714_s14 = inlined_call_operand.vmem [shape: f32[128,16], index: 14, kind: input, shape index: {}]   ;;  %s5715_s15 = inlined_call_operand.hbm [shape: f32[16,128], index: 15, kind: input, shape index: {}]   ;;  %s5716_s16 = inlined_call_operand.vmem [shape: f32[128,128], index: 16, kind: input, shape index: {}]   ;;  %s5717_s17 = inlined_call_operand.hbm [shape: f32[1,128], index: 17, kind: input, shape index: {}]   ;;  %s5718_s18 = inlined_call_operand.hbm [shape: f32[1,16], index: 18, kind: input, shape index: {}]   ;;  %s5719_s19 = inlined_call_operand.vmem [shape: f32[128,128], index: 19, kind: input, shape index: {}]   ;;  %s5720_s20 = inlined_call_operand.vmem [shape: f32[1,128], index: 20, kind: input, shape index: {}]   ;;  %s5721_s21 = inlined_call_operand.hbm [shape: f32[128,128], index: 21, kind: input, shape index: {}]   ;;  %s5722_s22 = inlined_call_operand.vmem [shape: f32[1,128], index: 22, kind: input, shape index: {}]   ;;  %s5723_s23 = inlined_call_operand.hbm [shape: f32[128,128], index: 23, kind: input, shape index: {}]   ;;  %s5724_s24 = inlined_call_operand.vmem [shape: f32[1,128], index: 24, kind: input, shape index: {}]   ;;  %s5725_s25 = inlined_call_operand.hbm [shape: f32[2,1,128], index: 25, kind: output, shape index: {}]  }
   0x1   :  { %5742 = sst [smem:[#allocation24_spill]] %s5700_s0 }
   0x2   :  { %5743 = sst [smem:[#allocation25_spill]] %s5701_s1 }
   0x3   :  { %5744 = sst [smem:[#allocation26_spill]] %s5702_s2 }
   0x4   :  { %5745 = sst [smem:[#allocation27_spill]] %s5703_s3 }
   0x5   :  { %5746 = sst [smem:[#allocation28_spill]] %s5704_s4 }
   0x6   :  { %5747 = sst [smem:[#allocation29_spill]] %s5705_s5 }
   0x7   :  { %5748 = sst [smem:[#allocation30_spill]] %s5706_s6 }
   0x8   :  { %5749 = sst [smem:[#allocation31_spill]] %s5707_s7 }
   0x9   :  { %5750 = sst [smem:[#allocation32_spill]] %s5708_s8 }
   0xa   :  { %5751 = sst [smem:[#allocation33_spill]] %s5709_s9 }
   0xb   :  { %5752 = sst [smem:[#allocation34_spill]] %s5711_s11 }
   0xc   :  { %5753 = sst [smem:[#allocation35_spill]] %s5716_s16 }
   0xd   :  { %5754 = sst [smem:[#allocation36_spill]] %s5717_s17 }
   0xe   :  { %5755 = sst [smem:[#allocation37_spill]] %s5719_s19 }
   0xf   :  { %5756 = sst [smem:[#allocation38_spill]] %s5720_s20 }
  0x10   :  { %5757 = sst [smem:[#allocation39_spill]] %s5722_s22 }
  0x11   :  { %5758 = sst [smem:[#allocation40_spill]] %s5724_s24 }
  0x12   :  { %5759 = sst [smem:[#allocation41_spill]] %s5725_s25 }
  0x13   :  { %30 = vsyncpa [#allocation3], 0 }
  0x14   :  { %32 = vsyncpa [#allocation3 + $0x1], 0 }
  0x15   :  { %33 = vsyncpa [#allocation6], 0 }
  0x16   :  { %34 = vsyncpa [#allocation9], 0 }
  0x17   :  { %35 = vsyncpa [#allocation12], 0 }
  0x18   :  { %36 = vsyncpa [#allocation15], 0 }
  0x19   :  { %37 = vsyncpa [#allocation4], 0 }
  0x1a   :  { %39 = vsyncpa [#allocation4 + $0x1], 0  ;;  %s4708_s29 = smov 0   ;;  %s4710_s2 = smov 0  }
  0x1b   :  { %s4712_s6 = smov 0   ;;  %s4714_s30 = smov 0  }
  0x1c LB: > { %s4560_s7 = smov [#allocation5]   ;;  %s4729_s26 = sadd.s32 4294967295, %s4558_s30   ;;  %s4558_s30 = sphi %s4714_s30, %s5804_s30   ;;  %s4554_s6 = sphi %s4712_s6, %s5803_s6   ;;  %s4550_s2 = sphi %s4710_s2, %s5802_s2   ;;  %s4546_s29 = sphi %s4708_s29, %s5801_s29  }
  0x1d   : > { %s637_s3 = sshll.u32 %s4560_s7, 4  ;;  %p3002_p0 = scmp.ge.s32.totalorder %s4558_s30, 1  ;;  %s4734_s3 = int_to_ptr.vmem [resolvable:$true] %s637_s3 }
  0x1e   : > { %p5734_p1 = scmp.eq.s32.totalorder %s4729_s26, 0  ;;  %p606_p2 = scmp.lt.s32.totalorder %s4558_s30, 3 }
  0x1f   : > { %s4561_s8 = smov [#allocation8]   ;;  %s4562_s28 = smov [#allocation11]  }
  0x20   : > { %p4736_p3 = pnand %p3002_p0, %p606_p2  ;;  %s666_s27 = sshll.u32 %s4561_s8, 4  ;;  %s4743_s27 = int_to_ptr.vmem [resolvable:$true] %s666_s27 }
  0x21   : > { %s705_s9 = sshll.u32 %s4562_s28, 4  ;;  %s5762_s7 = sld [smem:[#allocation31_spill]]  ;;  %s4751_s9 = int_to_ptr.vmem [resolvable:$true] %s705_s9 }
  0x22   : > { %s5760_s1 = scalar_select %p4736_p3, 1, 0 }
  0x23   : > { %p4045_p5 = pneg %p4736_p3 }
  0x25   : > { %p4747_p6 = pnand %p4045_p5, %p5734_p1 }
  0x27   : > { %s4222_s25 = scalar_lea.hbm %s5762_s7, 16  ;;  %p4761_p8 = pneg %p4747_p6 }
  0x28   : > { %p4223_p7 = scmp.ne.s32.totalorder %s5762_s7, %s4222_s25  ;;  %p4229_p11 = scmp.lt.u32.totalorder %s4222_s25, %s5762_s7 }
  0x2a   : > { %p4225_p9 = pnand %p4761_p8, %p4223_p7 }
  0x2c   : > { %p4226_p10 = pneg %p4225_p9 }
  0x2e   : > { %p4231_p12 = pnand %p4229_p11, %p4226_p10 }
  0x30   : > { %4234 = shalt.err (!%p4231_p12)
}
  0x31   : > { %s4235_s22 = scalar_lea.vmem %s4734_s3, 16  ;;  %s4242_s24 = scalar_lea.vmem %s4734_s3, 32 }
  0x32   : > { %p4236_p13 = scmp.ne.s32.totalorder %s4734_s3, %s4235_s22  ;;  %p4243_p5 = scmp.lt.s32.totalorder %s4734_s3, %s4734_s3 }
  0x33   : > { %p4244_p7 = scmp.lt.s32.totalorder %s4242_s24, %s4235_s22 }
  0x34   : > { %p4238_p0 = pnand %p4236_p13, %p4761_p8 }
  0x35   : > { %p4245_p9 = por %p4244_p7, %p4243_p5 }
  0x36   : > { %p4239_p2 = pneg %p4238_p0 }
  0x38   : > { %p4246_p4 = pnand %p4245_p9, %p4239_p2 }
  0x3a   : > { %4249 = shalt.err (!%p4246_p4)
}
  0x3b   : > { %4048 = dma.hbm_to_vmem [thread:$0]  (!%p4747_p6), %s5762_s7, 16, %s4734_s3, [#allocation6]  }
  0x3c   : > { %s5764_s11 = sld [smem:[#allocation34_spill]] }
  0x42   : > { %s4250_s28 = scalar_lea.hbm %s5764_s11, 6144 }
  0x43   : > { %p4251_p10 = scmp.ne.s32.totalorder %s5764_s11, %s4250_s28  ;;  %p4257_p4 = scmp.lt.u32.totalorder %s4250_s28, %s5764_s11 }
  0x45   : > { %p4253_p11 = pnand %p4251_p10, %p4761_p8 }
  0x47   : > { %p4254_p12 = pneg %p4253_p11 }
  0x49   : > { %p4259_p13 = pnand %p4257_p4, %p4254_p12 }
  0x4b   : > { %4262 = shalt.err (!%p4259_p13)
}
  0x4c   : > { %s4263_s3 = scalar_lea.vmem %s4743_s27, 6144  ;;  %p4271_p7 = scmp.lt.s32.totalorder %s4743_s27, %s4743_s27 }
  0x4d   : > { %p4264_p0 = scmp.ne.s32.totalorder %s4743_s27, %s4263_s3  ;;  %p4272_p9 = scmp.lt.s32.totalorder %s4263_s3, %s4263_s3 }
  0x4f   : > { %p4266_p2 = pnand %p4264_p0, %p4761_p8  ;;  %p4273_p10 = por %p4272_p9, %p4271_p7 }
  0x51   : > { %p4267_p5 = pneg %p4266_p2 }
  0x53   : > { %p4274_p11 = pnand %p4273_p10, %p4267_p5 }
  0x55   : > { %4277 = shalt.err (!%p4274_p11)
}
  0x56   : > { %s4563_s16 = smov 384   ;;  %s4564_s19 = smov 24  }
  0x57   : > { %4054 = dma.hbm_to_vmem [thread:$0]  (!%p4747_p6), %s5764_s11, 6144, %s4743_s27, [#allocation9], %s4563_s16, %s4563_s16, %s4564_s19  }
  0x58   : > { %s5765_s17 = sld [smem:[#allocation36_spill]] }
  0x5e   : > { %s4278_s28 = scalar_lea.hbm %s5765_s17, 16 }
  0x5f   : > { %p4279_p12 = scmp.ne.s32.totalorder %s5765_s17, %s4278_s28  ;;  %p4285_p0 = scmp.lt.u32.totalorder %s4278_s28, %s5765_s17 }
  0x61   : > { %p4281_p4 = pnand %p4279_p12, %p4761_p8 }
  0x63   : > { %p4282_p13 = pneg %p4281_p4 }
  0x65   : > { %p4287_p2 = pnand %p4285_p0, %p4282_p13 }
  0x67   : > { %4290 = shalt.err (!%p4287_p2)
}
  0x68   : > { %s4291_s27 = scalar_lea.vmem %s4751_s9, 16  ;;  %s4298_s16 = scalar_lea.vmem %s4751_s9, 32 }
  0x69   : > { %p4292_p5 = scmp.ne.s32.totalorder %s4751_s9, %s4291_s27  ;;  %p4299_p10 = scmp.lt.s32.totalorder %s4751_s9, %s4751_s9 }
  0x6a   : > { %p4300_p11 = scmp.lt.s32.totalorder %s4298_s16, %s4291_s27 }
  0x6b   : > { %p4294_p7 = pnand %p4292_p5, %p4761_p8 }
  0x6c   : > { %p4301_p12 = por %p4300_p11, %p4299_p10 }
  0x6d   : > { %p4295_p9 = pneg %p4294_p7 }
  0x6f   : > { %p4302_p4 = pnand %p4301_p12, %p4295_p9 }
  0x71   : > { %4305 = shalt.err (!%p4302_p4)
}
  0x72   : > { %4060 = dma.hbm_to_vmem [thread:$0]  (!%p4747_p6), %s5765_s17, 16, %s4751_s9, [#allocation12]  }
  0x73   : > { %s4565_s20 = smov [#allocation14]   ;;  %s4566_s5 = smov [#allocation7]  }
  0x74   : > { %s732_s25 = sshll.u32 %s4565_s20, 4  ;;  %s653_s0 = sshll.u32 %s4566_s5, 4  ;;  %s733_s25 = int_to_ptr.vmem [resolvable:$true] %s732_s25  ;;  %s654_s0 = int_to_ptr.vmem [resolvable:$true] %s653_s0 }
  0x75   : > { %s4306_s24 = scalar_lea.hbm %s5721_s21, 2048 }
  0x76   : > { %p4307_p13 = scmp.ne.s32.totalorder %s5721_s21, %s4306_s24  ;;  %p4313_p5 = scmp.lt.u32.totalorder %s4306_s24, %s5721_s21 }
  0x78   : > { %p4309_p0 = pnand %p4307_p13, %p4761_p8 }
  0x7a   : > { %p4310_p2 = pneg %p4309_p0 }
  0x7c   : > { %p4315_p7 = pnand %p4313_p5, %p4310_p2 }
  0x7e   : > { %4318 = shalt.err (!%p4315_p7)
}
  0x7f   : > { %s4319_s9 = scalar_lea.vmem %s733_s25, 2048  ;;  %p4327_p12 = scmp.lt.s32.totalorder %s733_s25, %s733_s25 }
  0x80   : > { %p4320_p9 = scmp.ne.s32.totalorder %s733_s25, %s4319_s9  ;;  %p4328_p4 = scmp.lt.s32.totalorder %s4319_s9, %s4319_s9 }
  0x82   : > { %p4322_p10 = pnand %p4320_p9, %p4761_p8  ;;  %p4329_p1 = por %p4328_p4, %p4327_p12 }
  0x84   : > { %p4323_p11 = pneg %p4322_p10 }
  0x86   : > { %p4330_p3 = pnand %p4329_p1, %p4323_p11 }
  0x88   : > { %4333 = shalt.err (!%p4330_p3)
}
  0x89   : > { %s5736_s19 = smov 128   ;;  %s5737_s20 = smov 8  }
  0x8a   : > { %4066 = dma.hbm_to_vmem [thread:$0]  (!%p4747_p6), %s5721_s21, 2048, %s733_s25, [#allocation15], %s5736_s19, %s5736_s19, %s5737_s20  }
  0x8b   : > { %s4334_s3 = scalar_lea.hbm %s5710_s10, 6144 }
  0x8c   : > { %p4335_p1 = scmp.ne.s32.totalorder %s5710_s10, %s4334_s3  ;;  %p4341_p0 = scmp.lt.u32.totalorder %s4334_s3, %s5710_s10 }
  0x8e   : > { %p4337_p3 = pnand %p4335_p1, %p4761_p8 }
  0x90   : > { %p4338_p13 = pneg %p4337_p3 }
  0x92   : > { %p4343_p2 = pnand %p4341_p0, %p4338_p13 }
  0x94   : > { %4346 = shalt.err (!%p4343_p2)
}
  0x95   : > { %s4347_s5 = scalar_lea.vmem %s654_s0, 6144  ;;  %p4355_p10 = scmp.lt.s32.totalorder %s654_s0, %s654_s0 }
  0x96   : > { %p4348_p5 = scmp.ne.s32.totalorder %s654_s0, %s4347_s5  ;;  %p4356_p11 = scmp.lt.s32.totalorder %s4347_s5, %s4347_s5 }
  0x98   : > { %p4350_p7 = pnand %p4348_p5, %p4761_p8  ;;  %p4357_p12 = por %p4356_p11, %p4355_p10 }
  0x9a   : > { %p4351_p9 = pneg %p4350_p7 }
  0x9c   : > { %p4358_p4 = pnand %p4357_p12, %p4351_p9 }
  0x9e   : > { %4361 = shalt.err (!%p4358_p4)
}
  0x9f   : > { %4051 = dma.hbm_to_vmem [thread:$0]  (!%p4747_p6), %s5710_s10, 6144, %s654_s0, [#allocation6], %s5736_s19, %s5736_s19, %s5737_s20  }
  0xa0   : > { %s4569_s22 = smov [#allocation10]   ;;  %s4570_s3 = smov [#allocation13]  }
  0xa1   : > { %s688_s24 = sshll.u32 %s4569_s22, 4  ;;  %s716_s27 = sshll.u32 %s4570_s3, 4  ;;  %s689_s24 = int_to_ptr.vmem [resolvable:$true] %s688_s24  ;;  %s717_s27 = int_to_ptr.vmem [resolvable:$true] %s716_s27 }
  0xa2   : > { %s4362_s9 = scalar_lea.hbm %s5715_s15, 256 }
  0xa3   : > { %p4363_p1 = scmp.ne.s32.totalorder %s5715_s15, %s4362_s9  ;;  %p4369_p0 = scmp.lt.u32.totalorder %s4362_s9, %s5715_s15 }
  0xa5   : > { %p4365_p3 = pnand %p4363_p1, %p4761_p8 }
  0xa7   : > { %p4366_p13 = pneg %p4365_p3 }
  0xa9   : > { %p4371_p2 = pnand %p4369_p0, %p4366_p13 }
  0xab   : > { %4374 = shalt.err (!%p4371_p2)
}
  0xac   : > { %s4375_s0 = scalar_lea.vmem %s689_s24, 256  ;;  %p4383_p10 = scmp.lt.s32.totalorder %s689_s24, %s689_s24 }
  0xad   : > { %p4376_p5 = scmp.ne.s32.totalorder %s689_s24, %s4375_s0  ;;  %p4384_p11 = scmp.lt.s32.totalorder %s4375_s0, %s4375_s0 }
  0xaf   : > { %p4378_p7 = pnand %p4376_p5, %p4761_p8  ;;  %p4385_p12 = por %p4384_p11, %p4383_p10 }
  0xb1   : > { %p4379_p9 = pneg %p4378_p7 }
  0xb3   : > { %p4386_p4 = pnand %p4385_p12, %p4379_p9 }
  0xb5   : > { %4389 = shalt.err (!%p4386_p4)
}
  0xb6   : > { %4057 = dma.hbm_to_vmem [thread:$0]  (!%p4747_p6), %s5715_s15, 256, %s689_s24, [#allocation9], %s5736_s19, %s5736_s19, %s5737_s20  }
  0xb7   : > { %s4390_s3 = scalar_lea.hbm %s5718_s18, 16 }
  0xb8   : > { %p4391_p1 = scmp.ne.s32.totalorder %s5718_s18, %s4390_s3  ;;  %p4397_p0 = scmp.lt.u32.totalorder %s4390_s3, %s5718_s18 }
  0xba   : > { %p4393_p3 = pnand %p4391_p1, %p4761_p8 }
  0xbc   : > { %p4394_p13 = pneg %p4393_p3 }
  0xbe   : > { %p4399_p2 = pnand %p4397_p0, %p4394_p13 }
  0xc0   : > { %4402 = shalt.err (!%p4399_p2)
}
  0xc1   : > { %s4403_s25 = scalar_lea.vmem %s717_s27, 16  ;;  %s4410_s24 = scalar_lea.vmem %s717_s27, 32 }
  0xc2   : > { %p4404_p5 = scmp.ne.s32.totalorder %s717_s27, %s4403_s25  ;;  %p4411_p10 = scmp.lt.s32.totalorder %s717_s27, %s717_s27 }
  0xc3   : > { %p4412_p11 = scmp.lt.s32.totalorder %s4410_s24, %s4403_s25 }
  0xc4   : > { %p4406_p7 = pnand %p4404_p5, %p4761_p8 }
  0xc5   : > { %p4413_p12 = por %p4412_p11, %p4411_p10 }
  0xc6   : > { %p4407_p9 = pneg %p4406_p7 }
  0xc8   : > { %p4414_p4 = pnand %p4413_p12, %p4407_p9 }
  0xca   : > { %4417 = shalt.err (!%p4414_p4)
}
  0xcb   : > { %4063 = dma.hbm_to_vmem [thread:$0]  (!%p4747_p6), %s5718_s18, 16, %s717_s27, [#allocation12]  }
  0xcc   : > { %s4571_s17 = smov [#allocation16]   ;;  %s4418_s16 = scalar_lea.hbm %s5723_s23, 2048 }
  0xcd   : > { %s748_s28 = sshll.u32 %s4571_s17, 4  ;;  %p4419_p1 = scmp.ne.s32.totalorder %s5723_s23, %s4418_s16  ;;  %s749_s28 = int_to_ptr.vmem [resolvable:$true] %s748_s28 }
  0xce   : > { %p4425_p0 = scmp.lt.u32.totalorder %s4418_s16, %s5723_s23 }
  0xcf   : > { %p4421_p3 = pnand %p4419_p1, %p4761_p8 }
  0xd1   : > { %p4422_p13 = pneg %p4421_p3 }
  0xd3   : > { %p4427_p2 = pnand %p4425_p0, %p4422_p13 }
  0xd5   : > { %4430 = shalt.err (!%p4427_p2)
}
  0xd6   : > { %s4431_s27 = scalar_lea.vmem %s749_s28, 2048  ;;  %p4439_p10 = scmp.lt.s32.totalorder %s749_s28, %s749_s28 }
  0xd7   : > { %p4432_p5 = scmp.ne.s32.totalorder %s749_s28, %s4431_s27  ;;  %p4440_p11 = scmp.lt.s32.totalorder %s4431_s27, %s4431_s27 }
  0xd9   : > { %p4434_p7 = pnand %p4432_p5, %p4761_p8  ;;  %p4441_p12 = por %p4440_p11, %p4439_p10 }
  0xdb   : > { %p4435_p9 = pneg %p4434_p7 }
  0xdd   : > { %p4442_p4 = pnand %p4441_p12, %p4435_p9 }
  0xdf   : > { %4445 = shalt.err (!%p4442_p4)
}
  0xe0   : > { %4069 = dma.hbm_to_vmem [thread:$0]  (!%p4747_p6), %s5723_s23, 2048, %s749_s28, [#allocation15], %s5736_s19, %s5736_s19, %s5737_s20  }
  0xe1   : > { %s3001_s4 = sadd.s32 4294967294, %s4558_s30   ;;  %s4934_s8 = sadd.s32 1, %s4558_s30  }
  0xe2   : > { %s49_s11 = ssub.s32 %s4558_s30, %s4934_s8  ;;  %s52_s17 = sadd.s32 1, %s4554_s6 }
  0xe3   : > { %p50_p8 = scmp.eq.s32.totalorder %s49_s11, 0  ;;  %p59_p1 = scmp.ne.s32.totalorder %s4554_s6, %s4550_s2 }
  0xe4   : > { %p60_p3 = scmp.eq.s32.totalorder %s4558_s30, 0  ;;  %p65_p13 = scmp.ne.s32.totalorder %s4550_s2, %s4546_s29 }
  0xe5   : > { %s4945_s22 = scalar_select %p50_p8, %s4554_s6, %s52_s17  }
  0xe6   : > { %p4947_p0 = por %p60_p3, %p59_p1  ;;  %p5767_p2 = scmp.eq.s32.totalorder %s4729_s26, 0 }
  0xe7   : > { %p593_p5 = scmp.eq.s32.totalorder %s4729_s26, 1  ;;  %p599_p7 = scmp.eq.s32.totalorder %s3001_s4, 1 }
  0xe8   : > { %p4953_p6 = por %p5767_p2, %p65_p13  ;;  %p4086_p9 = scmp.lt.s32.totalorder %s4558_s30, 2 }
  0xe9   : > { %s765_s16 = sand.u32 1, %s4554_s6   ;;  %p4960_p10 = por %p593_p5, %p59_p1 }
  0xea   : > { %p4964_p11 = por %p599_p7, %p65_p13  ;;  %s3012_s5 = sshll.u32 %s765_s16, 4 }
  0xeb   : > { %s5769_s7 = scalar_select %p4960_p10, 1, 0 }
  0xec   : > { %s5770_s9 = scalar_select %p4964_p11, 1, 0 }
  0xed   : > { %s3069_s25 = sshll.u32 %s4558_s30, 8  ;;  %s5771_s0 = sld [smem:[#allocation24_spill]] }
  0xee   : > { %s769_s4 = scalar_lea.vmem [#allocation2], %s3012_s5  ;;  %p4978_p12 = pnand %p4086_p9, %p4947_p0 }
  0xef   : > { %s776_s17 = sshll.u32 %s769_s4, 4  ;;  %s4982_s20 = scalar_lea.sflag [#allocation3], %s765_s16  ;;  %s4974_s17 = int_to_ptr.vmem [resolvable:$true] %s776_s17 }
  0xf0   : > { %p4448_p8 = pneg %p4978_p12 }
  0xf3   : > { %s4972_s11 = scalar_lea.hbm %s5771_s0, %s3069_s25  ;;  %s4451_s3 = scalar_lea.hbm %s5771_s0, 512 }
  0xf4   : > { %s4446_s27 = scalar_lea.hbm %s4972_s11, 256  ;;  %p4452_p13 = scmp.lt.u32.totalorder %s4972_s11, %s5771_s0 }
  0xf5   : > { %p4447_p4 = scmp.ne.s32.totalorder %s4972_s11, %s4446_s27  ;;  %p4453_p0 = scmp.lt.u32.totalorder %s4451_s3, %s4446_s27 }
  0xf6   : > { %p4455_p5 = scmp.lt.u32.totalorder %s4446_s27, %s4972_s11 }
  0xf7   : > { %p4449_p1 = pnand %p4448_p8, %p4447_p4  ;;  %p4454_p2 = por %p4453_p0, %p4452_p13 }
  0xf9   : > { %p4450_p3 = pneg %p4449_p1  ;;  %p4456_p7 = por %p4455_p5, %p4454_p2 }
  0xfb   : > { %p4457_p9 = pnand %p4456_p7, %p4450_p3 }
  0xfd   : > { %4460 = shalt.err (!%p4457_p9)
}
  0xfe   : > { %s4461_s16 = scalar_lea.vmem %s4974_s17, 256  ;;  %s4572_s5 = smov [#allocation2]  }
  0xff   : > { %p4462_p4 = scmp.ne.s32.totalorder %s4974_s17, %s4461_s16  ;;  %s4466_s25 = sshll.u32 %s4572_s5, 4  ;;  %s4467_s25 = int_to_ptr.vmem [resolvable:$false] %s4466_s25 }
 0x100   : > { %s4468_s24 = scalar_lea.vmem %s4467_s25, 512  ;;  %p4469_p10 = scmp.lt.s32.totalorder %s4974_s17, %s4467_s25 }
 0x101   : > { %p4464_p1 = pnand %p4462_p4, %p4448_p8  ;;  %p4470_p13 = scmp.lt.s32.totalorder %s4468_s24, %s4461_s16 }
 0x103   : > { %p4465_p11 = pneg %p4464_p1  ;;  %p4471_p0 = por %p4470_p13, %p4469_p10 }
 0x105   : > { %p4472_p2 = pnand %p4471_p0, %p4465_p11 }
 0x107   : > { %4475 = shalt.err (!%p4472_p2)
}
 0x108   : > { %s5773_s27 = smov 8   ;;  %s5774_s3 = smov 128  }
 0x109   : > { %4073 = dma.hbm_to_vmem [thread:$0]  (!%p4978_p12), %s4972_s11, 256, %s4974_s17, %s4982_s20, %s5774_s3, %s5774_s3, %s5773_s27  }
 0x10a   : > { %p5775_p8 = scmp.ne.s32.totalorder %s5760_s1, 0 }
 0x10b   : > { %s5016_s4 = sand.u32 (!%p5775_p8), 1, %s4550_s2  }
 0x10c   : > { %788 = sbr.rel (%p5775_p8) target bundleno = 4033 (0xfc1), region = 120  ;;  %s3016_s16 = sshll.u32 (!%p5775_p8), %s5016_s4, 4 }
 0x10d   : > { %s791_s5 = scalar_lea.sflag (!%p5775_p8), [#allocation3], %s5016_s4  ;;  %s794_s25 = scalar_lea.vmem (!%p5775_p8), [#allocation2], %s3016_s16 }
 0x113   : > { %4521 = dma.done.wait (%p4953_p6), %s791_s5, 256  }
 0x114   : > { %4523 = vsyncadd (%p4953_p6), %s791_s5, 4294967040  ;;  %p5776_p10 = scmp.eq.s32.totalorder %s4729_s26, 0 }
 0x116   : > { %4525 = dma.done.wait (%p5776_p10), [#allocation6], 6160   ;;  %p5777_p11 = pmov %p5776_p10 }
 0x117   : > { %p5778_p12 = pmov %p5776_p10 }
 0x118   : > { %4527 = vsyncadd (%p5777_p11), [#allocation6], 4294961136 }
 0x119   : > { %4529 = dma.done.wait (%p5778_p12), [#allocation9], 6400   ;;  %p5779_p3 = pmov %p5776_p10 }
 0x11b   : > { %4531 = vsyncadd (%p5779_p3), [#allocation9], 4294960896  ;;  %p5780_p5 = pmov %p5779_p3 }
 0x11c   : > { %p5781_p7 = pmov %p5779_p3 }
 0x11d   : > { %4533 = dma.done.wait (%p5780_p5), [#allocation12], 32  }
 0x11e   : > { %4535 = vsyncadd (%p5781_p7), [#allocation12], 4294967264  ;;  %p5782_p6 = pmov %p5779_p3 }
 0x11f   : > { %p5783_p9 = pmov %p5779_p3 }
 0x120   : > { %4537 = dma.done.wait (%p5782_p6), [#allocation15], 4096  }
 0x121   : > { %4539 = vsyncadd (%p5783_p9), [#allocation15], 4294963200  ;;  %v893_v0 = vld [vmem:[%s794_s25] sm:$0xff]  ;;  %v894_v1 = vld [vmem:[%s794_s25 + $0x8] sm:$0xff]  ;;  %v4573_v2 = vmov 0   ;;  %s5784_s20 = sld [smem:[#allocation32_spill]]  ;;  %v946_v55 = vlaneseq }
 0x122   : > { %898 = vadd.xlane.f32.xlu0 %v893_v0  ;;  %4145 = vset.pattern.permute.xlu1 %v4573_v2  ;;  %v1001_v4 = vld [vmem:[#allocation7 + $0x80] sm:$0xff]  ;;  %v1002_v5 = vld [vmem:[#allocation7 + $0x88] sm:$0xff]  ;;  %v1003_v6 = vld [vmem:[#allocation7 + $0x90] sm:$0xff]  ;;  %s5785_s17 = sld [smem:[#allocation25_spill]]  ;;  %s5787_s11 = sld [smem:[#allocation26_spill]]  ;;  %vm1561_vm2 = vcmask 130048  }
 0x123   : > { %4144 = vset.pattern.permute.xlu0 %v4573_v2  ;;  %v3692_v7 = vpack.c.bf16 %v1002_v5, %v1001_v4  ;;  %v1004_v8 = vld [vmem:[#allocation7 + $0x98] sm:$0xff]  ;;  %v1005_v21 = vld [vmem:[#allocation7 + $0xa0] sm:$0xff]  ;;  %v1006_v22 = vld [vmem:[#allocation7 + $0xa8] sm:$0xff]  ;;  %s5786_s5 = sld [smem:[#allocation33_spill]]  ;;  %s5788_s27 = sld [smem:[#allocation27_spill]]  ;;  %v5067_v60 = vshrl.u32 %v946_v55, 7 }
 0x124   : > { %v3696_v9 = vpack.c.bf16 %v1004_v8, %v1003_v6  ;;  %v3700_v23 = vpack.c.bf16 %v1006_v22, %v1005_v21  ;;  %v1007_v24 = vld [vmem:[#allocation7 + $0xb0] sm:$0xff]  ;;  %v1008_v25 = vld [vmem:[#allocation7 + $0xb8] sm:$0xff]  ;;  %v1009_v28 = vld [vmem:[#allocation7 + $0xc0] sm:$0xff]  ;;  %s5789_s25 = sld [smem:[#allocation28_spill]]  ;;  %s5790_s28 = sld [smem:[#allocation29_spill]]  ;;  %vm4576_vm3 = vmmov 0  }
 0x125   : > { %3693 = vmatprep.subr.bf16.mxu0 %v3692_v7  ;;  %v3704_v26 = vpack.c.bf16 %v1008_v25, %v1007_v24  ;;  %v1010_v29 = vld [vmem:[#allocation7 + $0xc8] sm:$0xff]  ;;  %v1011_v32 = vld [vmem:[#allocation7 + $0xd0] sm:$0xff]  ;;  %v1012_v33 = vld [vmem:[#allocation7 + $0xd8] sm:$0xff]  ;;  %vm948_vm0 = vcmp.lt.s32.totalorder %v5067_v60, 1  ;;  %vm967_vm1 = vcmp.lt.s32.totalorder %v5067_v60, 7  ;;  %s5791_s24 = sld [smem:[#allocation30_spill]] }
 0x126   : > { %900 = vadd.xlane.f32.xlu0 %v894_v1  ;;  %3695 = vmatpush3.bf16.msra.mxu0 %v3692_v7  ;;  %v3708_v30 = vpack.c.bf16 %v1010_v29, %v1009_v28  ;;  %v3712_v34 = vpack.c.bf16 %v1012_v33, %v1011_v32  ;;  %v1013_v36 = vld [vmem:[#allocation7 + $0xe0] sm:$0xff]  ;;  %v1014_v37 = vld [vmem:[#allocation7 + $0xe8] sm:$0xff]  ;;  %v1015_v39 = vld [vmem:[#allocation7 + $0xf0] sm:$0xff]  ;;  %s5793_s3 = sld [smem:[#allocation37_spill]]  ;;  %s3066_s1 = sshll.u32 %s4729_s26, 4 }
 0x127   : > { %v951_v3 = vld [vmem:[%s5784_s20] sm:$0xff]  ;;  %3697 = vmatprep.subr.bf16.mxu0 %v3696_v9  ;;  %v952_v27 = vld [vmem:[%s5784_s20 + $0x8] sm:$0xff]  ;;  %v3716_v38 = vpack.c.bf16 %v1014_v37, %v1013_v36  ;;  %v986_v61 = vld [vmem:[#allocation7 + $0x10] sm:$0xff]  ;;  %s891_s19 = scalar_lea.vmem [#allocation17], %s5016_s4  ;;  %p5798_p1 = scmp.ne.s32.totalorder %s5769_s7, 0 }
 0x128   : > { %v5046_v12 = vld [vmem:[%s5785_s17] ss:$0 sm:$0xff]  ;;  %v984_v42 = vld [vmem:[#allocation7] sm:$0xff]  ;;  %v985_v43 = vld [vmem:[#allocation7 + $0x8] sm:$0xff]  ;;  %s5792_s17 = sld [smem:[#allocation35_spill]]  ;;  %s4577_s26 = smov [#allocation17]  }
 0x129   : > { %v970_v31 = vld [vmem:[%s5786_s5] sm:$0xff]  ;;  %v971_v35 = vld [vmem:[%s5786_s5 + $0x8] sm:$0xff]  ;;  %v3724_v44 = vpack.c.bf16 %v985_v43, %v984_v42  ;;  %v1170_v33 = vld [vmem:[#allocation7 + $0x110] sm:$0xff]  ;;  %s2847_s5 = scalar_lea.sflag [#allocation4], %s5016_s4  ;;  %s4480_s0 = sshll.u32 %s4577_s26, 4  ;;  %s4481_s0 = int_to_ptr.vmem [resolvable:$false] %s4480_s0 }
 0x12a   : > { %3699 = vmatpush3.bf16.msra.mxu0 %v3696_v9  ;;  %v1016_v40 = vld [vmem:[#allocation7 + $0xf8] sm:$0xff]  ;;  %v988_v2 = vld [vmem:[#allocation7 + $0x20] sm:$0xff]  ;;  %v997_v21 = vld [vmem:[#allocation7 + $0x68] sm:$0xff] }
 0x12b   : > { %3701 = vmatprep.subr.bf16.mxu0 %v3700_v23  ;;  %v3720_v41 = vpack.c.bf16 %v1016_v40, %v1015_v39  ;;  %v3026_v52 = vld [vmem:[%s5787_s11] ss:$0 sm:$0xff]  ;;  %v1172_v40 = vld [vmem:[#allocation7 + $0x120] sm:$0xff]  ;;  %v1174_v43 = vld [vmem:[#allocation7 + $0x130] sm:$0xff] }
 0x12c   : > { %v3027_v54 = vld [vmem:[%s5788_s27] ss:$0 sm:$0xff]  ;;  %v1182_v55 = vld [vmem:[#allocation7 + $0x170] sm:$0xff]  ;;  %s5795_s27 = sld [smem:[#allocation39_spill]] }
 0x12d   : > { %v987_v62 = vld [vmem:[#allocation7 + $0x18] sm:$0xff] }
 0x12e   : > { %3703 = vmatpush3.bf16.msra.mxu0 %v3700_v23  ;;  %v998_v23 = vld [vmem:[#allocation7 + $0x70] sm:$0xff]  ;;  %v999_v24 = vld [vmem:[#allocation7 + $0x78] sm:$0xff] }
 0x12f   : > { %3705 = vmatprep.subr.bf16.mxu0 %v3704_v26  ;;  %v3752_v25 = vpack.c.bf16 %v999_v24, %v998_v23 }
 0x132   : > { %3707 = vmatpush3.bf16.msra.mxu0 %v3704_v26  ;;  %v1168_v26 = vld [vmem:[#allocation7 + $0x100] sm:$0xff] }
 0x133   : > { %3709 = vmatprep.subr.bf16.mxu0 %v3708_v30 }
 0x136   : > { %3711 = vmatpush3.bf16.msra.mxu0 %v3708_v30 }
 0x137   : > { %3713 = vmatprep.subr.bf16.mxu0 %v3712_v34 }
 0x13a   : > { %3715 = vmatpush3.bf16.msra.mxu0 %v3712_v34  ;;  %v1171_v34 = vld [vmem:[#allocation7 + $0x118] sm:$0xff] }
 0x13b   : > { %3717 = vmatprep.subr.bf16.mxu0 %v3716_v38 }
 0x13c   : > { %955 = vperm.xlu0 %4144, %v951_v3   ;;  %v989_v3 = vld [vmem:[#allocation7 + $0x28] sm:$0xff] }
 0x13d   : > { %v3732_v8 = vpack.c.bf16 %v989_v3, %v988_v2 }
 0x13e   : > { %3719 = vmatpush3.bf16.msra.mxu0 %v3716_v38  ;;  %v3760_v38 = vpack.c.bf16 %v1171_v34, %v1170_v33 }
 0x13f   : > { %3721 = vmatprep.subr.bf16.mxu0 %v3720_v41 }
 0x142   : > { %3723 = vmatpush3.bf16.msra.mxu0 %v3720_v41  ;;  %v1173_v41 = vld [vmem:[#allocation7 + $0x128] sm:$0xff] }
 0x143   : > { %3725 = vmatprep.subr.bf16.mxu0 %v3724_v44  ;;  %v3764_v42 = vpack.c.bf16 %v1173_v41, %v1172_v40  ;;  %v1357_v41 = vld [vmem:[#allocation8 + $0x60] sm:$0xff] }
 0x1af   : > { %v899_v10 = vpop.xlane.xlu0 %898 }
 0x1b0   : > { %v902_v11 = vmul.f32 0.015625, %v899_v10  ;;  %v990_v10 = vld [vmem:[#allocation7 + $0x30] sm:$0xff] }
 0x1b2   : > { %v904_v13 = vsub.f32 %v893_v0, %v902_v11  ;;  %v991_v11 = vld [vmem:[#allocation7 + $0x38] sm:$0xff] }
 0x1b3   : > { %v901_v14 = vpop.xlane.xlu0 %900 }
 0x1b4   : > { %v903_v15 = vmul.f32 0.015625, %v901_v14  ;;  %v912_v16 = vmul.f32 %v5046_v12, %v904_v13  ;;  %v3736_v13 = vpack.c.bf16 %v991_v11, %v990_v10  ;;  %v992_v14 = vld [vmem:[#allocation7 + $0x40] sm:$0xff] }
 0x1b6   : > { %v905_v17 = vsub.f32 %v894_v1, %v903_v15  ;;  %v914_v18 = vmul.f32 %v912_v16, %v912_v16  ;;  %v3728_v1 = vpack.c.bf16 %v987_v62, %v986_v61  ;;  %v993_v15 = vld [vmem:[#allocation7 + $0x48] sm:$0xff] }
 0x1b8   : > { %916 = vadd.xlane.f32.xlu1 %v914_v18  ;;  %v913_v19 = vmul.f32 %v5046_v12, %v905_v17  ;;  %v994_v17 = vld [vmem:[#allocation7 + $0x50] sm:$0xff]  ;;  %v995_v18 = vld [vmem:[#allocation7 + $0x58] sm:$0xff] }
 0x1ba   : > { %v915_v20 = vmul.f32 %v913_v19, %v913_v19 }
 0x1bb   : > { %v956_v6 = vpop.permute.xlu0 %955 }
 0x1bc   : > { %918 = vadd.xlane.f32.xlu1 %v915_v20  ;;  %v996_v20 = vld [vmem:[#allocation7 + $0x60] sm:$0xff] }
 0x1bd   : > { %v3748_v22 = vpack.c.bf16 %v997_v21, %v996_v20 }
 0x1cd   : > { %960 = vperm.xlu1 %4145, %v952_v27   ;;  %v1169_v27 = vld [vmem:[#allocation7 + $0x108] sm:$0xff] }
 0x1d1   : > { %974 = vperm.xlu1 %4145, %v970_v31   ;;  %v3756_v31 = vpack.c.bf16 %v1169_v27, %v1168_v26  ;;  %v1346_v26 = vld [vmem:[#allocation8 + $0x8] sm:$0xff]  ;;  %v1349_v27 = vld [vmem:[#allocation8 + $0x20] sm:$0xff] }
 0x1d5   : > { %979 = vperm.xlu1 %4145, %v971_v35  }
 0x245   : > { %v917_v45 = vpop.xlane.xlu1 %916 }
 0x246   : > { %v920_v46 = vmul.f32 0.015625, %v917_v45 }
 0x248   : > { %v922_v47 = vadd.f32 1e-05, %v920_v46  ;;  %v1176_v46 = vld [vmem:[#allocation7 + $0x140] sm:$0xff] }
 0x249   : > { %v919_v48 = vpop.xlane.xlu1 %918 }
 0x24a   : > { %4146 = vrsqrt.f32 %v922_v47  ;;  %v921_v49 = vmul.f32 0.015625, %v919_v48  ;;  %v1177_v47 = vld [vmem:[#allocation7 + $0x148] sm:$0xff] }
 0x24b   : > { %v3772_v48 = vpack.c.bf16 %v1177_v47, %v1176_v46 }
 0x24c   : > { %v923_v50 = vadd.f32 1e-05, %v921_v49  ;;  %v1178_v49 = vld [vmem:[#allocation7 + $0x150] sm:$0xff] }
 0x24d   : > { %v961_v28 = vpop.permute.xlu1 %960 }
 0x24e   : > { %4148 = vrsqrt.f32 %v923_v50  ;;  %v1179_v50 = vld [vmem:[#allocation7 + $0x158] sm:$0xff] }
 0x251   : > { %v975_v37 = vpop.permute.xlu1 %974 }
 0x254   : > { %v4147_v51 = vpop.eup %4146 }
 0x255   : > { %v926_v53 = vmul.f32 %v4147_v51, %v912_v16  ;;  %v3740_v16 = vpack.c.bf16 %v993_v15, %v992_v14  ;;  %v3776_v51 = vpack.c.bf16 %v1179_v50, %v1178_v49 }
 0x257   : > { %v934_v56 = vmul.f32 %v3026_v52, %v926_v53  ;;  %v1181_v53 = vld [vmem:[#allocation7 + $0x168] sm:$0xff] }
 0x258   : > { %v4149_v57 = vpop.eup %4148 }
 0x259   : > { %v927_v58 = vmul.f32 %v4149_v57, %v913_v19  ;;  %v5065_v59 = vadd.f32 %v3027_v54, %v934_v56  ;;  %v3744_v19 = vpack.c.bf16 %v995_v18, %v994_v17  ;;  %v1183_v56 = vld [vmem:[#allocation7 + $0x178] sm:$0xff] }
 0x25a   : > { %v3784_v57 = vpack.c.bf16 %v1183_v56, %v1182_v55  ;;  %v3028_v17 = vld [vmem:[%s5789_s25] ss:$0 sm:$0xff]  ;;  %v1367_v55 = vld [vmem:[#allocation8 + $0xb0] sm:$0xff]  ;;  %s5796_s25 = sld [smem:[#allocation40_spill]] }
 0x25b   : > { %v935_v63 = vmul.f32 %v3026_v52, %v927_v58  ;;  %3318 = vmatprep.mubr.f32.mxu0 %v5065_v59  ;;  %v944_v4 = vrot.slane %v5065_v59, 7  ;;  %v965_v30 = vrot.slane %v5065_v59, 1  ;;  %v1180_v52 = vld [vmem:[#allocation7 + $0x160] sm:$0xff]  ;;  %v980_v59 = vpop.permute.xlu1 %979 }
 0x25d   : > { %v5070_v0 = vadd.f32 %v3027_v54, %v935_v63  ;;  %v3780_v54 = vpack.c.bf16 %v1181_v53, %v1180_v52 }
 0x25f   : > { %v945_v5 = vrot.slane %v5070_v0, 7  ;;  %3319 = vmatmul.mubr.f32.vlgmr.msra.gmra.mrb[0].mxu0 %v5070_v0  ;;  %v966_v29 = vrot.slane %v5070_v0, 1 }
 0x260   : > { %3727 = vmatpush3.bf16.msra.mxu0 %v3724_v44  ;;  %v1175_v44 = vld [vmem:[#allocation7 + $0x138] sm:$0xff] }
 0x261   : > { %v950_v7 = vsel %vm948_vm0, %v945_v5, %v944_v4  ;;  %3729 = vmatprep.subr.bf16.mxu0 %v3728_v1  ;;  %v949_v32 = vsel %vm948_vm0, %v944_v4, %v945_v5  ;;  %v968_v35 = vsel %vm967_vm1, %v965_v30, %v966_v29  ;;  %v3768_v45 = vpack.c.bf16 %v1175_v44, %v1174_v43 }
 0x262   : > { %v963_v9 = vmul.f32 %v956_v6, %v950_v7  ;;  %v964_v36 = vmul.f32 %v961_v28, %v949_v32  ;;  %v982_v39 = vmul.f32 %v975_v37, %v968_v35  ;;  %v969_v58 = vsel %vm967_vm1, %v966_v29, %v965_v30  ;;  %v1345_v28 = vld [vmem:[#allocation8] sm:$0xff]  ;;  %v1348_v30 = vld [vmem:[#allocation8 + $0x18] sm:$0xff]  ;;  %v1355_v32 = vld [vmem:[#allocation8 + $0x50] sm:$0xff] }
 0x263   : > { %v983_v61 = vmul.f32 %v980_v59, %v969_v58  ;;  %v3788_v29 = vpack.c.bf16 %v1349_v27, %v1346_v26  ;;  %v3790_v33 = vpack.c.bf16 %v1348_v30, %v1345_v28  ;;  %v1351_v35 = vld [vmem:[#allocation8 + $0x30] sm:$0xff]  ;;  %v1358_v37 = vld [vmem:[#allocation8 + $0x68] sm:$0xff] }
 0x264   : > { %3731 = vmatpush3.bf16.msra.mxu0 %v3728_v1  ;;  %3353 = vmatprep.mubr.f32.mxu0 %v963_v9  ;;  %v1366_v58 = vld [vmem:[#allocation8 + $0xa8] sm:$0xff] }
 0x265   : > { %3733 = vmatprep.subr.bf16.mxu0 %v3732_v8  ;;  %3789 = vmatprep.subr.bf16.mxu1 %v3788_v29 }
 0x266   : > { %3791 = vmatpush1.bf16.msra.mxu1 %v3790_v33  ;;  %v3031_v33 = vld [vmem:[#allocation5] ss:$0 sm:$0xff] }
 0x268   : > { %3735 = vmatpush3.bf16.msra.mxu0 %v3732_v8 }
 0x269   : > { %3737 = vmatprep.subr.bf16.mxu0 %v3736_v13 }
 0x26c   : > { %3739 = vmatpush3.bf16.msra.mxu0 %v3736_v13 }
 0x26d   : > { %3741 = vmatprep.subr.bf16.mxu0 %v3740_v16 }
 0x270   : > { %3743 = vmatpush3.bf16.msra.mxu0 %v3740_v16 }
 0x271   : > { %3745 = vmatprep.subr.bf16.mxu0 %v3744_v19 }
 0x274   : > { %3747 = vmatpush3.bf16.msra.mxu0 %v3744_v19  ;;  %v3029_v19 = vld [vmem:[%s5790_s28] ss:$0 sm:$0xff]  ;;  %s5794_s28 = sld [smem:[#allocation38_spill]] }
 0x275   : > { %3749 = vmatprep.subr.bf16.mxu0 %v3748_v22 }
 0x278   : > { %3751 = vmatpush3.bf16.msra.mxu0 %v3748_v22 }
 0x279   : > { %3753 = vmatprep.subr.bf16.mxu0 %v3752_v25 }
 0x27c   : > { %3755 = vmatpush3.bf16.msra.mxu0 %v3752_v25 }
 0x27d   : > { %3757 = vmatprep.subr.bf16.mxu0 %v3756_v31 }
 0x27f   : > { %3354 = vmatmul.mubr.f32.vlgmr.msra.gmra.mrb[0].mxu0 %v964_v36  ;;  %v1354_v36 = vld [vmem:[#allocation8 + $0x48] sm:$0xff] }
 0x280   : > { %3759 = vmatpush3.bf16.msra.mxu0 %v3756_v31  ;;  %3388 = vmatprep.mubr.f32.mxu0 %v982_v39  ;;  %v1352_v31 = vld [vmem:[#allocation8 + $0x38] sm:$0xff]  ;;  %v3794_v39 = vpack.c.bf16 %v1354_v36, %v1351_v35 }
 0x281   : > { %3761 = vmatprep.subr.bf16.mxu0 %v3760_v38  ;;  %v3792_v34 = vpack.c.bf16 %v1355_v32, %v1352_v31  ;;  %v3030_v31 = vld [vmem:[%s5791_s24] ss:$0 sm:$0xff]  ;;  %s5797_s24 = sld [smem:[#allocation41_spill]] }
 0x282   : > { %v1356_v35 = vld [vmem:[#allocation8 + $0x58] sm:$0xff] }
 0x283   : > { %3793 = vmatprep.subr.bf16.mxu1 %v3792_v34  ;;  %v1353_v34 = vld [vmem:[#allocation8 + $0x40] sm:$0xff] }
 0x284   : > { %3763 = vmatpush3.bf16.msra.mxu0 %v3760_v38  ;;  %v1361_v38 = vld [vmem:[#allocation8 + $0x80] sm:$0xff]  ;;  %3795 = vmatpush1.bf16.msra.mxu1 %v3794_v39  ;;  %v3824_v39 = vpack.c.bf16 %v1356_v35, %v1353_v34 }
 0x285   : > { %3765 = vmatprep.subr.bf16.mxu0 %v3764_v42  ;;  %v3796_v40 = vpack.c.bf16 %v1361_v38, %v1358_v37 }
 0x287   : > { %3797 = vmatprep.subr.bf16.mxu1 %v3796_v40 }
 0x288   : > { %3767 = vmatpush3.bf16.msra.mxu0 %v3764_v42  ;;  %v1360_v42 = vld [vmem:[#allocation8 + $0x78] sm:$0xff] }
 0x289   : > { %3769 = vmatprep.subr.bf16.mxu0 %v3768_v45  ;;  %v3798_v43 = vpack.c.bf16 %v1360_v42, %v1357_v41  ;;  %v1359_v41 = vld [vmem:[#allocation8 + $0x70] sm:$0xff]  ;;  %v1362_v42 = vld [vmem:[#allocation8 + $0x88] sm:$0xff] }
 0x28b   : > { %3799 = vmatpush1.bf16.msra.mxu1 %v3798_v43 }
 0x28c   : > { %3771 = vmatpush3.bf16.msra.mxu0 %v3768_v45 }
 0x28d   : > { %3773 = vmatprep.subr.bf16.mxu0 %v3772_v48 }
 0x290   : > { %3775 = vmatpush3.bf16.msra.mxu0 %v3772_v48 }
 0x291   : > { %3777 = vmatprep.subr.bf16.mxu0 %v3776_v51 }
 0x294   : > { %3779 = vmatpush3.bf16.msra.mxu0 %v3776_v51 }
 0x295   : > { %3781 = vmatprep.subr.bf16.mxu0 %v3780_v54 }
 0x298   : > { %3783 = vmatpush3.bf16.msra.mxu0 %v3780_v54  ;;  %v1364_v54 = vld [vmem:[#allocation8 + $0x98] sm:$0xff] }
 0x299   : > { %3785 = vmatprep.subr.bf16.mxu0 %v3784_v57  ;;  %v3800_v56 = vpack.c.bf16 %v1367_v55, %v1364_v54  ;;  %v1383_v55 = vld [vmem:[#allocation8 + $0x130] sm:$0xff] }
 0x29b   : > { %3801 = vmatprep.subr.bf16.mxu1 %v3800_v56  ;;  %v1386_v56 = vld [vmem:[#allocation8 + $0x148] sm:$0xff] }
 0x29c   : > { %3787 = vmatpush3.bf16.msra.mxu0 %v3784_v57  ;;  %v1363_v57 = vld [vmem:[#allocation8 + $0x90] sm:$0xff] }
 0x29d   : > { %v3802_v59 = vpack.c.bf16 %v1366_v58, %v1363_v57  ;;  %v3844_v57 = vpack.c.bf16 %v1386_v56, %v1383_v55  ;;  %v1389_v58 = vld [vmem:[#allocation8 + $0x160] sm:$0xff]  ;;  %v5233_v55 = vld [vmem:[%s5712_s12 + $0x50] sm:$0xff] }
 0x29e   : > { %v5238_v56 = vld [vmem:[%s5712_s12 + $0x48] sm:$0xff] }
 0x29f   : > { %3389 = vmatmul.mubr.f32.vlgmr.msra.gmra.mrb[0].mxu0 %v983_v61  ;;  %3803 = vmatpush1.bf16.msra.mxu1 %v3802_v59  ;;  %v1370_v61 = vld [vmem:[#allocation8 + $0xc8] sm:$0xff]  ;;  %v1392_v59 = vld [vmem:[#allocation8 + $0x178] sm:$0xff] }
 0x372   : > { %v3390_v62 = vpop.f32.mrb[0].mxu0 }
 0x373   : > { %1265 = vadd.xlane.f32.xlu0 %v3390_v62  ;;  %v1250_v63 = vpop.f32.mrb[1].mxu0 }
 0x374   : > { %1263 = vadd.xlane.f32.xlu1 %v1250_v63 }
 0x400   : > { %v1266_v0 = vpop.xlane.xlu0 %1265 }
 0x401   : > { %v1268_v1 = vmul.f32 0.015625, %v1266_v0  ;;  %v1264_v2 = vpop.xlane.xlu1 %1263  ;;  %v1369_v0 = vld [vmem:[#allocation8 + $0xc0] sm:$0xff] }
 0x402   : > { %v1267_v3 = vmul.f32 0.015625, %v1264_v2 }
 0x403   : > { %v1270_v4 = vsub.f32 %v3390_v62, %v1268_v1  ;;  %v1373_v62 = vld [vmem:[#allocation8 + $0xe0] sm:$0xff]  ;;  %v1372_v1 = vld [vmem:[#allocation8 + $0xd8] sm:$0xff] }
 0x404   : > { %v1269_v5 = vsub.f32 %v1250_v63, %v1267_v3  ;;  %v3804_v63 = vpack.c.bf16 %v1373_v62, %v1370_v61  ;;  %v3806_v2 = vpack.c.bf16 %v1372_v1, %v1369_v0  ;;  %v1379_v3 = vld [vmem:[#allocation8 + $0x110] sm:$0xff]  ;;  %v3848_v61 = vpack.c.bf16 %v1392_v59, %v1389_v58  ;;  %v1545_v62 = vld [vmem:[%s5713_s13] sm:$0xff] }
 0x405   : > { %v1272_v60 = vmul.f32 %v5046_v12, %v1270_v4  ;;  %3430 = vmatprep.mubr.msk.f32.mxu0 %vm1561_vm2, %v1545_v62  ;;  %v5245_v62 = vld [vmem:[%s5712_s12 + $0x60] sm:$0xff] }
 0x406   : > { %v1271_v6 = vmul.f32 %v5046_v12, %v1269_v5  ;;  %3805 = vmatprep.subr.bf16.mxu1 %v3804_v63  ;;  %v1375_v5 = vld [vmem:[#allocation8 + $0xf0] sm:$0xff] }
 0x407   : > { %v1274_v8 = vmul.f32 %v1272_v60, %v1272_v60  ;;  %3807 = vmatpush1.bf16.msra.mxu1 %v3806_v2  ;;  %v1551_v63 = vld [vmem:[%s5713_s13 + $0x30] sm:$0xff] }
 0x408   : > { %v1273_v7 = vmul.f32 %v1271_v6, %v1271_v6 }
 0x40a   : > { %1275 = vadd.xlane.f32.xlu1 %v1273_v7 }
 0x40e   : > { %1277 = vadd.xlane.f32.xlu1 %v1274_v8  ;;  %v1385_v8 = vld [vmem:[#allocation8 + $0x140] sm:$0xff] }
 0x497   : > { %v1276_v9 = vpop.xlane.xlu1 %1275 }
 0x498   : > { %v1279_v10 = vmul.f32 0.015625, %v1276_v9  ;;  %v1381_v9 = vld [vmem:[#allocation8 + $0x120] sm:$0xff] }
 0x49a   : > { %v1281_v11 = vadd.f32 1e-05, %v1279_v10 }
 0x49b   : > { %v1278_v13 = vpop.xlane.xlu1 %1277 }
 0x49c   : > { %4150 = vrsqrt.f32 %v1281_v11  ;;  %v1280_v14 = vmul.f32 0.015625, %v1278_v13  ;;  %v1384_v11 = vld [vmem:[#allocation8 + $0x138] sm:$0xff] }
 0x49d   : > { %v1388_v13 = vld [vmem:[#allocation8 + $0x158] sm:$0xff] }
 0x49e   : > { %v1282_v15 = vadd.f32 1e-05, %v1280_v14  ;;  %v1391_v14 = vld [vmem:[#allocation8 + $0x170] sm:$0xff] }
 0x4a0   : > { %4152 = vrsqrt.f32 %v1282_v15  ;;  %v4574_v15 = vmov 0.0  }
 0x4a1   : > { %1457 = vmatprep.mubr.f32.mxu1 %v4574_v15 }
 0x4a6   : > { %v4151_v16 = vpop.eup %4150 }
 0x4a7   : > { %v1285_v18 = vmul.f32 %v4151_v16, %v1271_v6  ;;  %v1378_v6 = vld [vmem:[#allocation8 + $0x108] sm:$0xff]  ;;  %v3814_v16 = vpack.c.bf16 %v1384_v11, %v1381_v9 }
 0x4a8   : > { %v3810_v7 = vpack.c.bf16 %v1378_v6, %v1375_v5  ;;  %v1546_v5 = vld [vmem:[%s5713_s13 + $0x8] sm:$0xff]  ;;  %v1552_v6 = vld [vmem:[%s5713_s13 + $0x38] sm:$0xff]  ;;  %v1555_v11 = vld [vmem:[%s5713_s13 + $0x50] sm:$0xff] }
 0x4a9   : > { %v1293_v20 = vmul.f32 %v3028_v17, %v1285_v18  ;;  %v1387_v18 = vld [vmem:[#allocation8 + $0x150] sm:$0xff]  ;;  %v1554_v9 = vld [vmem:[%s5713_s13 + $0x48] sm:$0xff] }
 0x4aa   : > { %v4153_v21 = vpop.eup %4152 }
 0x4ab   : > { %v1301_v22 = vadd.f32 %v3029_v19, %v1293_v20  ;;  %v1286_v23 = vmul.f32 %v4153_v21, %v1272_v60  ;;  %v1382_v60 = vld [vmem:[#allocation8 + $0x128] sm:$0xff]  ;;  %v1347_v20 = vld [vmem:[#allocation8 + $0x10] sm:$0xff] }
 0x4ac   : > { %v3812_v10 = vpack.c.bf16 %v1385_v8, %v1382_v60  ;;  %v1350_v21 = vld [vmem:[#allocation8 + $0x28] sm:$0xff]  ;;  %v1553_v60 = vld [vmem:[%s5713_s13 + $0x40] sm:$0xff]  ;;  %v1548_v8 = vld [vmem:[%s5713_s13 + $0x18] sm:$0xff] }
 0x4ad   : > { %1305 = vadd.xlane.f32.xlu1 %v1301_v22  ;;  %v1294_v24 = vmul.f32 %v3028_v17, %v1286_v23  ;;  %v3816_v17 = vpack.c.bf16 %v1391_v14, %v1388_v13  ;;  %v3820_v23 = vpack.c.bf16 %v1350_v21, %v1347_v20  ;;  %v1550_v13 = vld [vmem:[%s5713_s13 + $0x28] sm:$0xff]  ;;  %v1556_v14 = vld [vmem:[%s5713_s13 + $0x58] sm:$0xff] }
 0x4af   : > { %v1302_v25 = vadd.f32 %v3029_v19, %v1294_v24  ;;  %v1390_v19 = vld [vmem:[#allocation8 + $0x168] sm:$0xff] }
 0x4b1   : > { %1307 = vadd.xlane.f32.xlu1 %v1302_v25 }
 0x53a   : > { %v1306_v44 = vpop.xlane.xlu1 %1305 }
 0x53b   : > { %v1309_v45 = vmul.f32 0.015625, %v1306_v44 }
 0x53d   : > { %v1311_v46 = vsub.f32 %v1301_v22, %v1309_v45  ;;  %v3818_v22 = vpack.c.bf16 %v1390_v19, %v1387_v18  ;;  %v3828_v45 = vpack.c.bf16 %v1362_v42, %v1359_v41  ;;  %v1559_v18 = vld [vmem:[%s5713_s13 + $0x70] sm:$0xff]  ;;  %v1560_v19 = vld [vmem:[%s5713_s13 + $0x78] sm:$0xff]  ;;  %v5213_v42 = vld [vmem:[%s5712_s12 + $0x28] sm:$0xff] }
 0x53e   : > { %v1308_v47 = vpop.xlane.xlu1 %1307 }
 0x53f   : > { %v1310_v48 = vmul.f32 0.015625, %v1308_v47  ;;  %v5096_v49 = vmul.f32 %v5046_v12, %v1311_v46  ;;  %v1365_v46 = vld [vmem:[#allocation8 + $0xa0] sm:$0xff]  ;;  %v1368_v47 = vld [vmem:[#allocation8 + $0xb8] sm:$0xff] }
 0x541   : > { %v1312_v50 = vsub.f32 %v1302_v25, %v1310_v48  ;;  %v1315_v51 = vmul.f32 %v5096_v49, %v5096_v49  ;;  %v3832_v48 = vpack.c.bf16 %v1368_v47, %v1365_v46 }
 0x543   : > { %1317 = vadd.xlane.f32.xlu0 %v1315_v51  ;;  %v5101_v52 = vmul.f32 %v5046_v12, %v1312_v50  ;;  %v1376_v12 = vld [vmem:[#allocation8 + $0xf8] sm:$0xff]  ;;  %v1374_v50 = vld [vmem:[#allocation8 + $0xe8] sm:$0xff] }
 0x544   : > { %v3808_v4 = vpack.c.bf16 %v1379_v3, %v1376_v12 }
 0x545   : > { %v1316_v53 = vmul.f32 %v5101_v52, %v5101_v52 }
 0x546   : > { %3809 = vmatprep.subr.bf16.mxu1 %v3808_v4 }
 0x547   : > { %1319 = vadd.xlane.f32.xlu1 %v1316_v53  ;;  %3811 = vmatpush1.bf16.msra.mxu1 %v3810_v7  ;;  %v1380_v53 = vld [vmem:[#allocation8 + $0x118] sm:$0xff]  ;;  %v1547_v7 = vld [vmem:[%s5713_s13 + $0x10] sm:$0xff] }
 0x548   : > { %3813 = vmatprep.subr.bf16.mxu1 %v3812_v10  ;;  %v1549_v10 = vld [vmem:[%s5713_s13 + $0x20] sm:$0xff] }
 0x54b   : > { %3815 = vmatpush1.bf16.msra.mxu1 %v3814_v16  ;;  %v1557_v16 = vld [vmem:[%s5713_s13 + $0x60] sm:$0xff] }
 0x54c   : > { %3817 = vmatprep.subr.bf16.mxu1 %v3816_v17  ;;  %v1558_v17 = vld [vmem:[%s5713_s13 + $0x68] sm:$0xff] }
 0x54f   : > { %3819 = vmatpush1.bf16.msra.mxu1 %v3818_v22 }
 0x550   : > { %3821 = vmatprep.subr.bf16.mxu1 %v3820_v23 }
 0x5d0   : > { %v1318_v24 = vpop.xlane.xlu0 %1317 }
 0x5d1   : > { %v1321_v25 = vmul.f32 0.015625, %v1318_v24 }
 0x5d3   : > { %v1323_v26 = vadd.f32 1e-05, %v1321_v25  ;;  %v5184_v25 = vld [vmem:[%s5712_s12 + $0x8] sm:$0xff] }
 0x5d4   : > { %v1320_v27 = vpop.xlane.xlu1 %1319 }
 0x5d5   : > { %4154 = vrsqrt.f32 %v1323_v26  ;;  %v1322_v28 = vmul.f32 0.015625, %v1320_v27 }
 0x5d7   : > { %v1324_v29 = vadd.f32 1e-05, %v1322_v28 }
 0x5d9   : > { %4156 = vrsqrt.f32 %v1324_v29 }
 0x5df   : > { %v4155_v30 = vpop.eup %4154 }
 0x5e0   : > { %v1327_v32 = vmul.f32 %v4155_v30, %v5096_v49  ;;  %v1371_v49 = vld [vmem:[#allocation8 + $0xd0] sm:$0xff] }
 0x5e1   : > { %v3836_v51 = vpack.c.bf16 %v1374_v50, %v1371_v49  ;;  %v5221_v49 = vld [vmem:[%s5712_s12 + $0x40] sm:$0xff]  ;;  %v5226_v50 = vld [vmem:[%s5712_s12 + $0x38] sm:$0xff] }
 0x5e2   : > { %v1335_v36 = vmul.f32 %v3030_v31, %v1327_v32 }
 0x5e3   : > { %v4157_v37 = vpop.eup %4156 }
 0x5e4   : > { %v1343_v38 = vadd.f32 %v3031_v33, %v1335_v36  ;;  %v1328_v40 = vmul.f32 %v4157_v37, %v5101_v52  ;;  %v1377_v52 = vld [vmem:[#allocation8 + $0x100] sm:$0xff] }
 0x5e5   : > { %v3840_v54 = vpack.c.bf16 %v1380_v53, %v1377_v52 }
 0x5e6   : > { %1458 = vmatmul.mubr.f32.vlgmr.msra.gmra.mrb[0].mxu1 %v1343_v38  ;;  %v1336_v43 = vmul.f32 %v3030_v31, %v1328_v40  ;;  %v5191_v31 = vld [vmem:[%s5712_s12 + $0x10] sm:$0xff] }
 0x5e7   : > { %3823 = vmatpush3.bf16.msra.mxu1 %v3820_v23  ;;  %1463 = vmatprep.mubr.f32.mxu1 %v4574_v15  ;;  %v5179_v23 = vld [vmem:[%s5712_s12] sm:$0xff]  ;;  %v5208_v40 = vld [vmem:[%s5712_s12 + $0x30] sm:$0xff] }
 0x5e8   : > { %3825 = vmatprep.subr.bf16.mxu1 %v3824_v39  ;;  %v1344_v44 = vadd.f32 %v3031_v33, %v1336_v43  ;;  %v5196_v33 = vld [vmem:[%s5712_s12 + $0x18] sm:$0xff] }
 0x5ea   : > { %1464 = vmatmul.mubr.f32.gmra.mrb[2].mxu1 %v1344_v44 }
 0x5eb   : > { %3827 = vmatpush3.bf16.msra.mxu1 %v3824_v39  ;;  %3423 = vmatprep.mubr.f32.mxu1 %v1343_v38  ;;  %v5203_v39 = vld [vmem:[%s5712_s12 + $0x20] sm:$0xff] }
 0x5ec   : > { %3829 = vmatprep.subr.bf16.mxu1 %v3828_v45 }
 0x5ef   : > { %3831 = vmatpush3.bf16.msra.mxu1 %v3828_v45 }
 0x5f0   : > { %3833 = vmatprep.subr.bf16.mxu1 %v3832_v48 }
 0x5f3   : > { %3835 = vmatpush3.bf16.msra.mxu1 %v3832_v48 }
 0x5f4   : > { %3837 = vmatprep.subr.bf16.mxu1 %v3836_v51 }
 0x5f7   : > { %3839 = vmatpush3.bf16.msra.mxu1 %v3836_v51 }
 0x5f8   : > { %3841 = vmatprep.subr.bf16.mxu1 %v3840_v54 }
 0x5fb   : > { %3843 = vmatpush3.bf16.msra.mxu1 %v3840_v54 }
 0x5fc   : > { %3845 = vmatprep.subr.bf16.mxu1 %v3844_v57 }
 0x5ff   : > { %3847 = vmatpush3.bf16.msra.mxu1 %v3844_v57 }
 0x600   : > { %3849 = vmatprep.subr.bf16.mxu1 %v3848_v61 }
 0x603   : > { %3851 = vmatpush3.bf16.msra.mxu1 %v3848_v61 }
 0x606   : > { %3424 = vmatmul.mubr.f32.vlgmr.msra.gmra.mrb[4].mxu1 %v1344_v44 }
 0x607   : > { %3439 = vmatprep.mubr.msk.f32.mxu1 %vm1561_vm2, %v1551_v63  ;;  %v5250_v63 = vld [vmem:[%s5712_s12 + $0x58] sm:$0xff] }
 0x6b9   : > { %v1459_v0 = vpop.f32.mrb[0].mxu1 }
 0x6ba   : > { %v1461_v1 = vpop.f32.mrb[1].mxu1 }
 0x6bd   : > { %v1465_v2 = vpop.f32.mrb[2].mxu1 }
 0x6be   : > { %v3852_v12 = vpack.c.bf16 %v1465_v2, %v1459_v0  ;;  %v1467_v3 = vpop.f32.mrb[3].mxu1  ;;  %v5257_v2 = vld [vmem:[%s5712_s12 + $0x70] sm:$0xff] }
 0x6bf   : > { %v3856_v4 = vpack.c.bf16 %v1467_v3, %v1461_v1 }
 0x6c0   : > { %3853 = vmatprep.subr.bf16.mxu0 %v3852_v12  ;;  %4003 = vmatprep.subr.bf16.mxu1 %v3852_v12 }
 0x6c1   : > { %3855 = vmatpush3.bf16.msra.mxu0 %v3852_v12  ;;  %4004 = vmatpush3.bf16.msra.mxu1 %v3852_v12  ;;  %v5262_v12 = vld [vmem:[%s5712_s12 + $0x68] sm:$0xff] }
 0x6c2   : > { %3857 = vmatprep.subr.bf16.mxu1 %v3856_v4 }
 0x6c4   : > { %3431 = vmatmul.mubr.msk.f32.vlgmr.msra.gmra.mrb[2].mxu0 %vm1561_vm2, %v1546_v5  ;;  %3440 = vmatmul.mubr.msk.f32.vlgmr.msra.gmra.mrb[6].mxu1 %vm1561_vm2, %v1552_v6  ;;  %v5269_v5 = vld [vmem:[%s5712_s12 + $0x78] sm:$0xff] }
 0x6c5   : > { %3433 = vmatprep.mubr.msk.f32.mxu0 %vm1561_vm2, %v1547_v7  ;;  %3442 = vmatprep.mubr.msk.f32.mxu1 %vm1561_vm2, %v1553_v60  ;;  %v1788_v7 = vld [vmem:[%s5714_s14 + $0x8] sm:$0xff]  ;;  %v1787_v60 = vld [vmem:[%s5714_s14] sm:$0xff] }
 0x6c8   : > { %3434 = vmatmul.mubr.msk.f32.gmra.mrb[4].mxu0 %vm1561_vm2, %v1548_v8  ;;  %3443 = vmatmul.mubr.msk.f32.gmra.mrb[8].mxu1 %vm1561_vm2, %v1554_v9 }
 0x6c9   : > { %3436 = vmatprep.mubr.msk.f32.mxu0 %vm1561_vm2, %v1549_v10  ;;  %3445 = vmatprep.mubr.msk.f32.mxu1 %vm1561_vm2, %v1555_v11 }
 0x6ca   : > { %3859 = vmatpush3.bf16.xpose.msra.mxu1 %v3856_v4 }
 0x6cc   : > { %3437 = vmatmul.mubr.msk.f32.gmra.mrb[6].mxu0 %vm1561_vm2, %v1550_v13  ;;  %3446 = vmatmul.mubr.msk.f32.gmra.mrb[10].mxu1 %vm1561_vm2, %v1556_v14  ;;  %v1790_v13 = vld [vmem:[%s5714_s14 + $0x18] sm:$0xff] }
 0x6cd   : > { %3448 = vmatprep.mubr.msk.f32.mxu1 %vm1561_vm2, %v1557_v16  ;;  %v1789_v16 = vld [vmem:[%s5714_s14 + $0x10] sm:$0xff] }
 0x6d0   : > { %3449 = vmatmul.mubr.msk.f32.gmra.mrb[12].mxu1 %vm1561_vm2, %v1558_v17 }
 0x6d1   : > { %3451 = vmatprep.mubr.msk.f32.mxu1 %vm1561_vm2, %v1559_v18 }
 0x6d4   : > { %3452 = vmatmul.mubr.msk.f32.gmra.mrb[14].mxu1 %vm1561_vm2, %v1560_v19 }
 0x6d9   : > { %v3425_v20 = vpop.f32.mrb[4].mxu1 }
 0x6da   : > { %v1536_v21 = vpop.f32.mrb[5].mxu1 }
 0x6db   : > { %v3860_v22 = vpack.c.bf16 %v3425_v20, %v1536_v21 }
 0x6dd   : > { %3861 = vmatprep.subr.bf16.mxu0 %v3860_v22 }
 0x6de   : > { %3863 = vmatpush3.bf16.msra.mxu0 %v3860_v22  ;;  %v1792_v22 = vld [vmem:[%s5714_s14 + $0x28] sm:$0xff] }
 0x797   : > { %v3432_v24 = vpop.f32.mrb[2].mxu0  ;;  %v3441_v26 = vpop.f32.mrb[6].mxu1 }
 0x798   : > { %v1676_v27 = vpop.f32.mrb[3].mxu0  ;;  %v1706_v28 = vpop.f32.mrb[7].mxu1  ;;  %v1772_v30 = vmul.f32 %v3432_v24, %v5184_v25  ;;  %v1778_v54 = vmul.f32 %v3441_v26, %v5226_v50  ;;  %v1791_v26 = vld [vmem:[%s5714_s14 + $0x20] sm:$0xff] }
 0x799   : > { %v1771_v29 = vmul.f32 %v5179_v23, %v1676_v27  ;;  %v1777_v47 = vmul.f32 %v5208_v40, %v1706_v28 }
 0x79b   : > { %v3435_v32 = vpop.f32.mrb[4].mxu0  ;;  %3458 = vmatprep.mubr.f32.mxu1 %v1771_v29  ;;  %v3444_v34 = vpop.f32.mrb[8].mxu1 }
 0x79c   : > { %v1686_v35 = vpop.f32.mrb[5].mxu0  ;;  %3459 = vmatmul.mubr.f32.vlgmr.msra.gmra.mrb[16].mxu1 %v1772_v30  ;;  %v1716_v36 = vpop.f32.mrb[9].mxu1  ;;  %v1774_v38 = vmul.f32 %v3435_v32, %v5196_v33  ;;  %v1780_v61 = vmul.f32 %v3444_v34, %v5238_v56  ;;  %v1794_v34 = vld [vmem:[%s5714_s14 + $0x38] sm:$0xff] }
 0x79d   : > { %v1773_v37 = vmul.f32 %v5191_v31, %v1686_v35  ;;  %v1779_v53 = vmul.f32 %v5221_v49, %v1716_v36  ;;  %v1793_v36 = vld [vmem:[%s5714_s14 + $0x30] sm:$0xff] }
 0x79f   : > { %v3438_v41 = vpop.f32.mrb[6].mxu0  ;;  %3461 = vmatprep.mubr.f32.mxu1 %v1773_v37  ;;  %v3447_v43 = vpop.f32.mrb[10].mxu1 }
 0x7a0   : > { %v1696_v44 = vpop.f32.mrb[7].mxu0  ;;  %3462 = vmatmul.mubr.f32.gmra.mrb[18].mxu1 %v1774_v38  ;;  %v1726_v45 = vpop.f32.mrb[11].mxu1  ;;  %v1776_v48 = vmul.f32 %v3438_v41, %v5213_v42  ;;  %v1782_v1 = vmul.f32 %v3447_v43, %v5250_v63 }
 0x7a1   : > { %v1775_v46 = vmul.f32 %v5203_v39, %v1696_v44  ;;  %v1781_v59 = vmul.f32 %v5233_v55, %v1726_v45  ;;  %v1796_v45 = vld [vmem:[%s5714_s14 + $0x48] sm:$0xff] }
 0x7a3   : > { %3464 = vmatprep.mubr.f32.mxu1 %v1775_v46  ;;  %v3450_v51 = vpop.f32.mrb[12].mxu1 }
 0x7a4   : > { %3465 = vmatmul.mubr.f32.gmra.mrb[20].mxu1 %v1776_v48  ;;  %v1736_v52 = vpop.f32.mrb[13].mxu1  ;;  %v1784_v4 = vmul.f32 %v3450_v51, %v5262_v12 }
 0x7a5   : > { %3467 = vmatprep.mubr.f32.mxu1 %v1777_v47  ;;  %v1783_v0 = vmul.f32 %v5245_v62, %v1736_v52  ;;  %v1795_v47 = vld [vmem:[%s5714_s14 + $0x40] sm:$0xff] }
 0x7a7   : > { %v3453_v57 = vpop.f32.mrb[14].mxu1 }
 0x7a8   : > { %3468 = vmatmul.mubr.f32.gmra.mrb[22].mxu1 %v1778_v54  ;;  %v1746_v58 = vpop.f32.mrb[15].mxu1  ;;  %v1786_v6 = vmul.f32 %v3453_v57, %v5269_v5  ;;  %v1798_v57 = vld [vmem:[%s5714_s14 + $0x58] sm:$0xff] }
 0x7a9   : > { %3470 = vmatprep.mubr.f32.mxu1 %v1779_v53  ;;  %v1785_v3 = vmul.f32 %v5257_v2, %v1746_v58 }
 0x7ac   : > { %3471 = vmatmul.mubr.f32.gmra.mrb[24].mxu1 %v1780_v61 }
 0x7ad   : > { %3473 = vmatprep.mubr.f32.mxu1 %v1781_v59  ;;  %v1797_v59 = vld [vmem:[%s5714_s14 + $0x50] sm:$0xff] }
 0x7b0   : > { %3474 = vmatmul.mubr.f32.gmra.mrb[26].mxu1 %v1782_v1 }
 0x7b1   : > { %3476 = vmatprep.mubr.f32.mxu1 %v1783_v0 }
 0x7b4   : > { %3477 = vmatmul.mubr.f32.gmra.mrb[28].mxu1 %v1784_v4 }
 0x7b5   : > { %3479 = vmatprep.mubr.f32.mxu1 %v1785_v3 }
 0x7b8   : > { %3480 = vmatmul.mubr.f32.gmra.mrb[30].mxu1 %v1786_v6  ;;  %v1800_v6 = vld [vmem:[%s5714_s14 + $0x68] sm:$0xff] }
 0x86f   : > { %v3460_v8 = vpop.f32.mrb[16].mxu1 }
 0x870   : > { %v5278_v9 = vadd.f32 %v3460_v8, %v1788_v7  ;;  %v1869_v10 = vpop.f32.mrb[17].mxu1 }
 0x871   : > { %v5280_v11 = vadd.f32 %v1869_v10, %v1787_v60  ;;  %v1799_v60 = vld [vmem:[%s5714_s14 + $0x60] sm:$0xff] }
 0x872   : > { %v1951_v14 = vsel %vm1561_vm2, %v5278_v9, -inf }
 0x873   : > { %1952 = vmax.xlane.f32.xlu1 %v1951_v14  ;;  %v3463_v17 = vpop.f32.mrb[18].mxu1  ;;  %v1948_v18 = vsel %vm1561_vm2, %v5280_v11, -inf }
 0x874   : > { %v5292_v19 = vadd.f32 %v3463_v17, %v1790_v13  ;;  %v1879_v20 = vpop.f32.mrb[19].mxu1  ;;  %1949 = vmax.xlane.f32.xlu0 %v1948_v18  ;;  %v1802_v17 = vld [vmem:[%s5714_s14 + $0x78] sm:$0xff] }
 0x875   : > { %v5294_v21 = vadd.f32 %v1879_v20, %v1789_v16  ;;  %v1801_v20 = vld [vmem:[%s5714_s14 + $0x70] sm:$0xff] }
 0x876   : > { %v1957_v24 = vsel %vm1561_vm2, %v5292_v19, -inf }
 0x877   : > { %1958 = vmax.xlane.f32.xlu1 %v1957_v24  ;;  %v3466_v27 = vpop.f32.mrb[20].mxu1  ;;  %v1954_v28 = vsel %vm1561_vm2, %v5294_v21, -inf }
 0x878   : > { %v5306_v29 = vadd.f32 %v3466_v27, %v1792_v22  ;;  %v1889_v30 = vpop.f32.mrb[21].mxu1  ;;  %1955 = vmax.xlane.f32.xlu0 %v1954_v28 }
 0x879   : > { %v5308_v32 = vadd.f32 %v1889_v30, %v1791_v26 }
 0x87a   : > { %v1963_v35 = vsel %vm1561_vm2, %v5306_v29, -inf }
 0x87b   : > { %1964 = vmax.xlane.f32.xlu1 %v1963_v35  ;;  %v3469_v37 = vpop.f32.mrb[22].mxu1  ;;  %v1960_v38 = vsel %vm1561_vm2, %v5308_v32, -inf }
 0x87c   : > { %v5320_v41 = vadd.f32 %v3469_v37, %v1794_v34  ;;  %v1899_v43 = vpop.f32.mrb[23].mxu1  ;;  %1961 = vmax.xlane.f32.xlu0 %v1960_v38 }
 0x87d   : > { %v5322_v44 = vadd.f32 %v1899_v43, %v1793_v36 }
 0x87e   : > { %v1969_v46 = vsel %vm1561_vm2, %v5320_v41, -inf }
 0x87f   : > { %1970 = vmax.xlane.f32.xlu1 %v1969_v46  ;;  %v3472_v48 = vpop.f32.mrb[24].mxu1  ;;  %v1966_v51 = vsel %vm1561_vm2, %v5322_v44, -inf }
 0x880   : > { %v5334_v52 = vadd.f32 %v3472_v48, %v1796_v45  ;;  %v1909_v53 = vpop.f32.mrb[25].mxu1  ;;  %1967 = vmax.xlane.f32.xlu0 %v1966_v51 }
 0x881   : > { %v5336_v54 = vadd.f32 %v1909_v53, %v1795_v47 }
 0x882   : > { %v1975_v58 = vsel %vm1561_vm2, %v5334_v52, -inf }
 0x883   : > { %1976 = vmax.xlane.f32.xlu1 %v1975_v58  ;;  %v3475_v61 = vpop.f32.mrb[26].mxu1  ;;  %v1972_v0 = vsel %vm1561_vm2, %v5336_v54, -inf }
 0x884   : > { %v5348_v1 = vadd.f32 %v3475_v61, %v1798_v57  ;;  %v1919_v3 = vpop.f32.mrb[27].mxu1  ;;  %1973 = vmax.xlane.f32.xlu0 %v1972_v0 }
 0x885   : > { %v5350_v4 = vadd.f32 %v1919_v3, %v1797_v59 }
 0x886   : > { %v1981_v7 = vsel %vm1561_vm2, %v5348_v1, -inf }
 0x887   : > { %1982 = vmax.xlane.f32.xlu1 %v1981_v7  ;;  %v3478_v8 = vpop.f32.mrb[28].mxu1  ;;  %v1978_v10 = vsel %vm1561_vm2, %v5350_v4, -inf }
 0x888   : > { %v5362_v13 = vadd.f32 %v3478_v8, %v1800_v6  ;;  %v1929_v14 = vpop.f32.mrb[29].mxu1  ;;  %1979 = vmax.xlane.f32.xlu0 %v1978_v10 }
 0x889   : > { %v5364_v16 = vadd.f32 %v1929_v14, %v1799_v60 }
 0x88a   : > { %v1987_v18 = vsel %vm1561_vm2, %v5362_v13, -inf }
 0x88b   : > { %1988 = vmax.xlane.f32.xlu1 %v1987_v18  ;;  %v3481_v22 = vpop.f32.mrb[30].mxu1  ;;  %v1984_v24 = vsel %vm1561_vm2, %v5364_v16, -inf }
 0x88c   : > { %v5376_v26 = vadd.f32 %v3481_v22, %v1802_v17  ;;  %1985 = vmax.xlane.f32.xlu0 %v1984_v24  ;;  %v1939_v27 = vpop.f32.mrb[31].mxu1 }
 0x88d   : > { %v5378_v28 = vadd.f32 %v1939_v27, %v1801_v20 }
 0x88e   : > { %v1993_v30 = vsel %vm1561_vm2, %v5376_v26, -inf }
 0x88f   : > { %1994 = vmax.xlane.f32.xlu1 %v1993_v30  ;;  %v1990_v34 = vsel %vm1561_vm2, %v5378_v28, -inf }
 0x890   : > { %1991 = vmax.xlane.f32.xlu0 %v1990_v34 }
 0x900   : > { %v1953_v35 = vpop.xlane.xlu1 %1952 }
 0x901   : > { %v1997_v36 = vsub.f32 %v5278_v9, %v1953_v35  ;;  %v1950_v37 = vpop.xlane.xlu0 %1949 }
 0x902   : > { %v1996_v38 = vsub.f32 %v5280_v11, %v1950_v37 }
 0x903   : > { %v2014_v43 = vmul.f32 1.442695, %v1997_v36 }
 0x904   : > { %v2012_v45 = vmul.f32 1.442695, %v1996_v38  ;;  %v1959_v46 = vpop.xlane.xlu1 %1958 }
 0x905   : > { %4158 = vpow2.f32 %v2014_v43  ;;  %v1999_v47 = vsub.f32 %v5292_v19, %v1959_v46  ;;  %v1956_v48 = vpop.xlane.xlu0 %1955 }
 0x906   : > { %4160 = vpow2.f32 %v2012_v45  ;;  %v1998_v51 = vsub.f32 %v5294_v21, %v1956_v48 }
 0x907   : > { %v2018_v53 = vmul.f32 1.442695, %v1999_v47 }
 0x908   : > { %v2016_v57 = vmul.f32 1.442695, %v1998_v51  ;;  %v1965_v58 = vpop.xlane.xlu1 %1964 }
 0x909   : > { %4162 = vpow2.f32 %v2018_v53  ;;  %v2001_v59 = vsub.f32 %v5306_v29, %v1965_v58  ;;  %v1962_v9 = vpop.xlane.xlu0 %1961 }
 0x90a   : > { %4164 = vpow2.f32 %v2016_v57  ;;  %v2000_v11 = vsub.f32 %v5308_v32, %v1962_v9 }
 0x90b   : > { %v2022_v61 = vmul.f32 1.442695, %v2001_v59 }
 0x90c   : > { %v2020_v0 = vmul.f32 1.442695, %v2000_v11  ;;  %v1971_v3 = vpop.xlane.xlu1 %1970 }
 0x90d   : > { %4166 = vpow2.f32 %v2022_v61  ;;  %v2003_v19 = vsub.f32 %v5320_v41, %v1971_v3  ;;  %v1968_v6 = vpop.xlane.xlu0 %1967 }
 0x90e   : > { %4168 = vpow2.f32 %v2020_v0  ;;  %v2002_v21 = vsub.f32 %v5322_v44, %v1968_v6 }
 0x90f   : > { %v5392_v7 = vpop.eup %4158  ;;  %v2026_v60 = vmul.f32 1.442695, %v2003_v19 }
 0x910   : > { %v5394_v8 = vpop.eup %4160  ;;  %v2024_v29 = vmul.f32 1.442695, %v2002_v21  ;;  %v1977_v10 = vpop.xlane.xlu1 %1976  ;;  %v2047_v32 = vsel %vm1561_vm2, %v5392_v7, 0.0 }
 0x911   : > { %4170 = vpow2.f32 %v2026_v60  ;;  %v2005_v14 = vsub.f32 %v5334_v52, %v1977_v10  ;;  %v1974_v17 = vpop.xlane.xlu0 %1973  ;;  %2048 = vadd.xlane.f32.xlu1 %v2047_v32  ;;  %v2044_v41 = vsel %vm1561_vm2, %v5394_v8, 0.0 }
 0x912   : > { %4172 = vpow2.f32 %v2024_v29  ;;  %v2004_v44 = vsub.f32 %v5336_v54, %v1974_v17  ;;  %2045 = vadd.xlane.f32.xlu0 %v2044_v41 }
 0x913   : > { %v5402_v18 = vpop.eup %4162  ;;  %v2030_v20 = vmul.f32 1.442695, %v2005_v14 }
 0x914   : > { %v5404_v22 = vpop.eup %4164  ;;  %v2028_v24 = vmul.f32 1.442695, %v2004_v44  ;;  %v1983_v27 = vpop.xlane.xlu1 %1982  ;;  %v2053_v30 = vsel %vm1561_vm2, %v5402_v18, 0.0 }
 0x915   : > { %4174 = vpow2.f32 %v2030_v20  ;;  %v2007_v52 = vsub.f32 %v5348_v1, %v1983_v27  ;;  %v1980_v34 = vpop.xlane.xlu0 %1979  ;;  %2054 = vadd.xlane.f32.xlu1 %v2053_v30  ;;  %v2050_v35 = vsel %vm1561_vm2, %v5404_v22, 0.0 }
 0x916   : > { %4176 = vpow2.f32 %v2028_v24  ;;  %v2006_v54 = vsub.f32 %v5350_v4, %v1980_v34  ;;  %2051 = vadd.xlane.f32.xlu0 %v2050_v35 }
 0x917   : > { %v5412_v36 = vpop.eup %4166  ;;  %v2034_v37 = vmul.f32 1.442695, %v2007_v52 }
 0x918   : > { %v5414_v38 = vpop.eup %4168  ;;  %v2032_v43 = vmul.f32 1.442695, %v2006_v54  ;;  %v1989_v45 = vpop.xlane.xlu1 %1988  ;;  %v2059_v46 = vsel %vm1561_vm2, %v5412_v36, 0.0 }
 0x919   : > { %4178 = vpow2.f32 %v2034_v37  ;;  %v2009_v1 = vsub.f32 %v5362_v13, %v1989_v45  ;;  %v1986_v47 = vpop.xlane.xlu0 %1985  ;;  %2060 = vadd.xlane.f32.xlu1 %v2059_v46  ;;  %v2056_v48 = vsel %vm1561_vm2, %v5414_v38, 0.0 }
 0x91a   : > { %4180 = vpow2.f32 %v2032_v43  ;;  %v2008_v4 = vsub.f32 %v5364_v16, %v1986_v47  ;;  %2057 = vadd.xlane.f32.xlu0 %v2056_v48 }
 0x91b   : > { %v5422_v51 = vpop.eup %4170  ;;  %v2038_v53 = vmul.f32 1.442695, %v2009_v1 }
 0x91c   : > { %v5424_v57 = vpop.eup %4172  ;;  %v2036_v58 = vmul.f32 1.442695, %v2008_v4  ;;  %v1995_v59 = vpop.xlane.xlu1 %1994  ;;  %v2065_v9 = vsel %vm1561_vm2, %v5422_v51, 0.0 }
 0x91d   : > { %4182 = vpow2.f32 %v2038_v53  ;;  %v2011_v13 = vsub.f32 %v5376_v26, %v1995_v59  ;;  %2066 = vadd.xlane.f32.xlu1 %v2065_v9  ;;  %v1992_v11 = vpop.xlane.xlu0 %1991  ;;  %v2062_v61 = vsel %vm1561_vm2, %v5424_v57, 0.0 }
 0x91e   : > { %4184 = vpow2.f32 %v2036_v58  ;;  %v2010_v16 = vsub.f32 %v5378_v28, %v1992_v11  ;;  %2063 = vadd.xlane.f32.xlu0 %v2062_v61 }
 0x91f   : > { %v5432_v0 = vpop.eup %4174  ;;  %v2042_v3 = vmul.f32 1.442695, %v2011_v13 }
 0x920   : > { %v5434_v19 = vpop.eup %4176  ;;  %v2040_v6 = vmul.f32 1.442695, %v2010_v16  ;;  %v2071_v21 = vsel %vm1561_vm2, %v5432_v0, 0.0 }
 0x921   : > { %4186 = vpow2.f32 %v2042_v3  ;;  %2072 = vadd.xlane.f32.xlu1 %v2071_v21  ;;  %v2068_v26 = vsel %vm1561_vm2, %v5434_v19, 0.0 }
 0x922   : > { %4188 = vpow2.f32 %v2040_v6  ;;  %2069 = vadd.xlane.f32.xlu0 %v2068_v26 }
 0x923   : > { %v5440_v60 = vpop.eup %4178 }
 0x924   : > { %v5442_v28 = vpop.eup %4180  ;;  %v2077_v29 = vsel %vm1561_vm2, %v5440_v60, 0.0 }
 0x925   : > { %2078 = vadd.xlane.f32.xlu1 %v2077_v29  ;;  %v2074_v10 = vsel %vm1561_vm2, %v5442_v28, 0.0 }
 0x926   : > { %2075 = vadd.xlane.f32.xlu0 %v2074_v10 }
 0x927   : > { %v5448_v32 = vpop.eup %4182 }
 0x928   : > { %v5450_v14 = vpop.eup %4184  ;;  %v2083_v17 = vsel %vm1561_vm2, %v5448_v32, 0.0 }
 0x929   : > { %2084 = vadd.xlane.f32.xlu1 %v2083_v17  ;;  %v2080_v41 = vsel %vm1561_vm2, %v5450_v14, 0.0 }
 0x92a   : > { %2081 = vadd.xlane.f32.xlu0 %v2080_v41 }
 0x92b   : > { %v5456_v44 = vpop.eup %4186 }
 0x92c   : > { %v5458_v20 = vpop.eup %4188  ;;  %v2089_v24 = vsel %vm1561_vm2, %v5456_v44, 0.0 }
 0x92d   : > { %2090 = vadd.xlane.f32.xlu1 %v2089_v24  ;;  %v2086_v27 = vsel %vm1561_vm2, %v5458_v20, 0.0 }
 0x92e   : > { %2087 = vadd.xlane.f32.xlu0 %v2086_v27 }
 0x99e   : > { %v2049_v30 = vpop.xlane.xlu1 %2048 }
 0x99f   : > { %4190 = vrcp.f32 %v2049_v30  ;;  %v2046_v52 = vpop.xlane.xlu0 %2045 }
 0x9a0   : > { %4192 = vrcp.f32 %v2046_v52 }
 0x9a2   : > { %v2055_v34 = vpop.xlane.xlu1 %2054 }
 0x9a3   : > { %4194 = vrcp.f32 %v2055_v34  ;;  %v2052_v35 = vpop.xlane.xlu0 %2051 }
 0x9a4   : > { %4196 = vrcp.f32 %v2052_v35 }
 0x9a6   : > { %v2061_v54 = vpop.xlane.xlu1 %2060 }
 0x9a7   : > { %4198 = vrcp.f32 %v2061_v54  ;;  %v2058_v37 = vpop.xlane.xlu0 %2057 }
 0x9a8   : > { %4200 = vrcp.f32 %v2058_v37  ;;  %v2317_v37 = vld [vmem:[#allocation10] sm:$0xff] }
 0x9a9   : > { %v4191_v43 = vpop.eup %4190 }
 0x9aa   : > { %v4193_v45 = vpop.eup %4192  ;;  %v2067_v46 = vpop.xlane.xlu1 %2066  ;;  %v2109_v48 = vmul.f32 %v4191_v43, %v5392_v7 }
 0x9ab   : > { %4202 = vrcp.f32 %v2067_v46  ;;  %v2064_v1 = vpop.xlane.xlu0 %2063  ;;  %v2108_v47 = vmul.f32 %v4193_v45, %v5394_v8  ;;  %v2414_v46 = vld [vmem:[%s5792_s17 + $0x20] sm:$0xff] }
 0x9ac   : > { %4204 = vrcp.f32 %v2064_v1  ;;  %v2415_v1 = vld [vmem:[%s5792_s17 + $0x28] sm:$0xff] }
 0x9ad   : > { %v4195_v4 = vpop.eup %4194  ;;  %3486 = vmatprep.mubr.msk.f32.mxu0 %vm1561_vm2, %v2108_v47  ;;  %v3904_v47 = vpack.c.bf16 %v2415_v1, %v2414_v46  ;;  %v2584_v1 = vld [vmem:[%s5793_s3 + $0x10] sm:$0xff] }
 0x9ae   : > { %v4197_v53 = vpop.eup %4196  ;;  %v2073_v58 = vpop.xlane.xlu1 %2072  ;;  %3487 = vmatmul.mubr.msk.f32.vlgmr.msra.gmra.mrb[8].mxu0 %vm1561_vm2, %v2109_v48  ;;  %v2111_v13 = vmul.f32 %v4195_v4, %v5402_v18  ;;  %v2416_v48 = vld [vmem:[%s5792_s17 + $0x30] sm:$0xff]  ;;  %v2417_v4 = vld [vmem:[%s5792_s17 + $0x38] sm:$0xff] }
 0x9af   : > { %4206 = vrcp.f32 %v2073_v58  ;;  %v2070_v59 = vpop.xlane.xlu0 %2069  ;;  %v2110_v9 = vmul.f32 %v4197_v53, %v5404_v22  ;;  %v3908_v53 = vpack.c.bf16 %v2417_v4, %v2416_v48  ;;  %v2418_v58 = vld [vmem:[%s5792_s17 + $0x40] sm:$0xff]  ;;  %v2585_v48 = vld [vmem:[%s5793_s3 + $0x18] sm:$0xff] }
 0x9b0   : > { %4208 = vrcp.f32 %v2070_v59  ;;  %v2419_v59 = vld [vmem:[%s5792_s17 + $0x48] sm:$0xff]  ;;  %v3935_v4 = vpack.c.bf16 %v2585_v48, %v2584_v1  ;;  %v2763_v1 = vld [vmem:[#allocation16 + $0x28] sm:$0xff] }
 0x9b1   : > { %v4199_v11 = vpop.eup %4198  ;;  %3489 = vmatprep.mubr.msk.f32.mxu0 %vm1561_vm2, %v2110_v9  ;;  %v3912_v9 = vpack.c.bf16 %v2419_v59, %v2418_v58  ;;  %v2587_v58 = vld [vmem:[%s5793_s3 + $0x28] sm:$0xff] }
 0x9b2   : > { %v4201_v8 = vpop.eup %4200  ;;  %v2079_v7 = vpop.xlane.xlu1 %2078  ;;  %3490 = vmatmul.mubr.msk.f32.gmra.mrb[10].mxu0 %vm1561_vm2, %v2111_v13  ;;  %v2113_v3 = vmul.f32 %v4199_v11, %v5412_v36  ;;  %v2420_v13 = vld [vmem:[%s5792_s17 + $0x50] sm:$0xff]  ;;  %v2421_v11 = vld [vmem:[%s5792_s17 + $0x58] sm:$0xff] }
 0x9b3   : > { %4210 = vrcp.f32 %v2079_v7  ;;  %v2076_v61 = vpop.xlane.xlu0 %2075  ;;  %v2112_v16 = vmul.f32 %v4201_v8, %v5414_v38  ;;  %v3916_v8 = vpack.c.bf16 %v2421_v11, %v2420_v13  ;;  %v2422_v7 = vld [vmem:[%s5792_s17 + $0x60] sm:$0xff]  ;;  %v2589_v13 = vld [vmem:[%s5793_s3 + $0x38] sm:$0xff]  ;;  %v2765_v48 = vld [vmem:[#allocation16 + $0x38] sm:$0xff] }
 0x9b4   : > { %4212 = vrcp.f32 %v2076_v61  ;;  %v2423_v61 = vld [vmem:[%s5792_s17 + $0x68] sm:$0xff] }
 0x9b5   : > { %v4203_v6 = vpop.eup %4202  ;;  %3492 = vmatprep.mubr.msk.f32.mxu0 %vm1561_vm2, %v2112_v16  ;;  %v3920_v16 = vpack.c.bf16 %v2423_v61, %v2422_v7  ;;  %v2591_v7 = vld [vmem:[%s5793_s3 + $0x48] sm:$0xff] }
 0x9b6   : > { %v4205_v22 = vpop.eup %4204  ;;  %v2085_v21 = vpop.xlane.xlu1 %2084  ;;  %3493 = vmatmul.mubr.msk.f32.gmra.mrb[12].mxu0 %vm1561_vm2, %v2113_v3  ;;  %v2115_v29 = vmul.f32 %v4203_v6, %v5422_v51  ;;  %v2424_v3 = vld [vmem:[%s5792_s17 + $0x70] sm:$0xff]  ;;  %v2425_v6 = vld [vmem:[%s5792_s17 + $0x78] sm:$0xff] }
 0x9b7   : > { %4214 = vrcp.f32 %v2085_v21  ;;  %v2082_v18 = vpop.xlane.xlu0 %2081  ;;  %v2114_v26 = vmul.f32 %v4205_v22, %v5424_v57  ;;  %v3924_v22 = vpack.c.bf16 %v2425_v6, %v2424_v3  ;;  %v2593_v3 = vld [vmem:[%s5793_s3 + $0x58] sm:$0xff] }
 0x9b8   : > { %4216 = vrcp.f32 %v2082_v18 }
 0x9b9   : > { %v4207_v10 = vpop.eup %4206  ;;  %3495 = vmatprep.mubr.msk.f32.mxu0 %vm1561_vm2, %v2114_v26 }
 0x9ba   : > { %v4209_v38 = vpop.eup %4208  ;;  %v2091_v17 = vpop.xlane.xlu1 %2090  ;;  %3496 = vmatmul.mubr.msk.f32.gmra.mrb[14].mxu0 %vm1561_vm2, %v2115_v29  ;;  %v2117_v24 = vmul.f32 %v4207_v10, %v5432_v0 }
 0x9bb   : > { %4218 = vrcp.f32 %v2091_v17  ;;  %v2088_v36 = vpop.xlane.xlu0 %2087  ;;  %v2116_v41 = vmul.f32 %v4209_v38, %v5434_v19 }
 0x9bc   : > { %4220 = vrcp.f32 %v2088_v36 }
 0x9bd   : > { %v4211_v27 = vpop.eup %4210  ;;  %3498 = vmatprep.mubr.msk.f32.mxu0 %vm1561_vm2, %v2116_v41 }
 0x9be   : > { %v4213_v57 = vpop.eup %4212  ;;  %3499 = vmatmul.mubr.msk.f32.gmra.mrb[16].mxu0 %vm1561_vm2, %v2117_v24  ;;  %v2119_v30 = vmul.f32 %v4211_v27, %v5440_v60 }
 0x9bf   : > { %v2118_v51 = vmul.f32 %v4213_v57, %v5442_v28 }
 0x9c1   : > { %v4215_v52 = vpop.eup %4214  ;;  %3501 = vmatprep.mubr.msk.f32.mxu0 %vm1561_vm2, %v2118_v51 }
 0x9c2   : > { %v4217_v34 = vpop.eup %4216  ;;  %3502 = vmatmul.mubr.msk.f32.gmra.mrb[18].mxu0 %vm1561_vm2, %v2119_v30  ;;  %v2121_v0 = vmul.f32 %v4215_v52, %v5448_v32  ;;  %v2410_v32 = vld [vmem:[%s5792_s17] sm:$0xff] }
 0x9c3   : > { %v2120_v19 = vmul.f32 %v4217_v34, %v5450_v14  ;;  %v2411_v14 = vld [vmem:[%s5792_s17 + $0x8] sm:$0xff] }
 0x9c4   : > { %v3896_v43 = vpack.c.bf16 %v2411_v14, %v2410_v32 }
 0x9c5   : > { %v4219_v35 = vpop.eup %4218  ;;  %3504 = vmatprep.mubr.msk.f32.mxu0 %vm1561_vm2, %v2120_v19 }
 0x9c6   : > { %v4221_v54 = vpop.eup %4220  ;;  %3505 = vmatmul.mubr.msk.f32.gmra.mrb[20].mxu0 %vm1561_vm2, %v2121_v0  ;;  %v2123_v60 = vmul.f32 %v4219_v35, %v5456_v44  ;;  %v2413_v44 = vld [vmem:[%s5792_s17 + $0x18] sm:$0xff]  ;;  %3897 = vmatprep.subr.bf16.mxu1 %v3896_v43 }
 0x9c7   : > { %v2122_v28 = vmul.f32 %v4221_v54, %v5458_v20  ;;  %v2412_v20 = vld [vmem:[%s5792_s17 + $0x10] sm:$0xff]  ;;  %3899 = vmatpush3.bf16.msra.mxu1 %v3896_v43 }
 0x9c8   : > { %v3900_v45 = vpack.c.bf16 %v2413_v44, %v2412_v20 }
 0x9c9   : > { %3507 = vmatprep.mubr.msk.f32.mxu0 %vm1561_vm2, %v2122_v28 }
 0x9ca   : > { %3508 = vmatmul.mubr.msk.f32.gmra.mrb[22].mxu0 %vm1561_vm2, %v2123_v60  ;;  %3901 = vmatprep.subr.bf16.mxu1 %v3900_v45 }
 0x9cb   : > { %3542 = vmatprep.mubr.f32.mxu0 %v2317_v37  ;;  %3903 = vmatpush3.bf16.msra.mxu1 %v3900_v45  ;;  %v2318_v45 = vld [vmem:[#allocation10 + $0x8] sm:$0xff] }
 0x9cc   : > { %3905 = vmatprep.subr.bf16.mxu1 %v3904_v47 }
 0x9cf   : > { %3907 = vmatpush3.bf16.msra.mxu1 %v3904_v47 }
 0x9d0   : > { %3909 = vmatprep.subr.bf16.mxu1 %v3908_v53 }
 0x9d3   : > { %3911 = vmatpush3.bf16.msra.mxu1 %v3908_v53  ;;  %v2586_v53 = vld [vmem:[%s5793_s3 + $0x20] sm:$0xff] }
 0x9d4   : > { %3913 = vmatprep.subr.bf16.mxu1 %v3912_v9  ;;  %v3938_v59 = vpack.c.bf16 %v2587_v58, %v2586_v53  ;;  %v2766_v53 = vld [vmem:[#allocation16 + $0x40] sm:$0xff]  ;;  %v2767_v58 = vld [vmem:[#allocation16 + $0x48] sm:$0xff] }
 0x9d7   : > { %3915 = vmatpush3.bf16.msra.mxu1 %v3912_v9  ;;  %v2588_v9 = vld [vmem:[%s5793_s3 + $0x30] sm:$0xff] }
 0x9d8   : > { %3917 = vmatprep.subr.bf16.mxu1 %v3916_v8  ;;  %v3941_v11 = vpack.c.bf16 %v2589_v13, %v2588_v9  ;;  %v2768_v9 = vld [vmem:[#allocation16 + $0x50] sm:$0xff]  ;;  %v2769_v13 = vld [vmem:[#allocation16 + $0x58] sm:$0xff] }
 0x9db   : > { %3919 = vmatpush3.bf16.msra.mxu1 %v3916_v8  ;;  %v2590_v8 = vld [vmem:[%s5793_s3 + $0x40] sm:$0xff] }
 0x9dc   : > { %3921 = vmatprep.subr.bf16.mxu1 %v3920_v16  ;;  %v3944_v61 = vpack.c.bf16 %v2591_v7, %v2590_v8  ;;  %v2770_v8 = vld [vmem:[#allocation16 + $0x60] sm:$0xff]  ;;  %v2771_v7 = vld [vmem:[#allocation16 + $0x68] sm:$0xff] }
 0x9df   : > { %3923 = vmatpush3.bf16.msra.mxu1 %v3920_v16  ;;  %v2592_v16 = vld [vmem:[%s5793_s3 + $0x50] sm:$0xff] }
 0x9e0   : > { %3925 = vmatprep.subr.bf16.mxu1 %v3924_v22  ;;  %v3947_v6 = vpack.c.bf16 %v2593_v3, %v2592_v16  ;;  %v2598_v16 = vld [vmem:[%s5794_s28] sm:$0x1]  ;;  %s2859_s28 = sshll.u32 %s891_s19, 4  ;;  %s5658_s28 = int_to_ptr.vmem [resolvable:$true] %s2859_s28 }
 0x9e1   : > { %s4476_s16 = scalar_lea.vmem %s5658_s28, 16  ;;  %p4483_p2 = scmp.lt.s32.totalorder %s5658_s28, %s4481_s0 }
 0x9e2   : > { %p4477_p4 = scmp.ne.s32.totalorder %s5658_s28, %s4476_s16 }
 0x9e3   : > { %3927 = vmatpush3.bf16.msra.mxu1 %v3924_v22  ;;  %v2594_v22 = vld [vmem:[%s5793_s3 + $0x60] sm:$0xff] }
 0x9e4   : > { %p4478_p13 = pnand %p4477_p4, %p5798_p1 }
 0x9e6   : > { %p4479_p0 = pneg %p4478_p13 }
 0xa81   : > { %v3488_v21 = vpop.f32.mrb[8].mxu0 }
 0xa82   : > { %v2320_v18 = vmul.f32 %v3488_v21, %v5184_v25  ;;  %v2238_v26 = vpop.f32.mrb[9].mxu0  ;;  %v2595_v21 = vld [vmem:[%s5793_s3 + $0x68] sm:$0xff] }
 0xa83   : > { %v2319_v29 = vmul.f32 %v2238_v26, %v5179_v23  ;;  %v2596_v26 = vld [vmem:[%s5793_s3 + $0x70] sm:$0xff] }
 0xa85   : > { %v3864_v10 = vpack.c.bf16 %v2320_v18, %v2319_v29  ;;  %v3491_v38 = vpop.f32.mrb[10].mxu0  ;;  %v3950_v18 = vpack.c.bf16 %v2595_v21, %v2594_v22  ;;  %v2597_v29 = vld [vmem:[%s5793_s3 + $0x78] sm:$0xff] }
 0xa86   : > { %v2322_v17 = vmul.f32 %v3491_v38, %v5196_v33  ;;  %v2248_v36 = vpop.f32.mrb[11].mxu0  ;;  %v3064_v38 = vld [vmem:[#allocation11] ss:$0 sm:$0xff] }
 0xa87   : > { %v2321_v41 = vmul.f32 %v2248_v36, %v5191_v31  ;;  %3865 = vmatprep.subr.bf16.mxu0 %v3864_v10 }
 0xa88   : > { %3867 = vmatpush3.bf16.msra.mxu0 %v3864_v10  ;;  %v3953_v10 = vpack.c.bf16 %v2597_v29, %v2596_v26  ;;  %v2773_v26 = vld [vmem:[#allocation16 + $0x78] sm:$0xff] }
 0xa89   : > { %v3868_v24 = vpack.c.bf16 %v2322_v17, %v2321_v41  ;;  %v3494_v27 = vpop.f32.mrb[12].mxu0 }
 0xa8a   : > { %v2324_v57 = vmul.f32 %v3494_v27, %v5213_v42  ;;  %v2258_v51 = vpop.f32.mrb[13].mxu0 }
 0xa8b   : > { %v2323_v30 = vmul.f32 %v2258_v51, %v5203_v39  ;;  %3869 = vmatprep.subr.bf16.mxu0 %v3868_v24  ;;  %v2670_v51 = vld [vmem:[#allocation14] sm:$0xff] }
 0xa8c   : > { %3871 = vmatpush3.bf16.msra.mxu0 %v3868_v24 }
 0xa8d   : > { %v3872_v25 = vpack.c.bf16 %v2324_v57, %v2323_v30  ;;  %v3497_v23 = vpop.f32.mrb[14].mxu0  ;;  %v2508_v57 = vld [vmem:[#allocation13] sm:$0x1]  ;;  %v2671_v30 = vld [vmem:[#allocation14 + $0x8] sm:$0xff] }
 0xa8e   : > { %v2326_v52 = vmul.f32 %v3497_v23, %v5226_v50  ;;  %v2268_v34 = vpop.f32.mrb[15].mxu0  ;;  %v3956_v23 = vpack.c.bf16 %v2671_v30, %v2670_v51 }
 0xa8f   : > { %v2325_v33 = vmul.f32 %v2268_v34, %v5208_v40  ;;  %3873 = vmatprep.subr.bf16.mxu0 %v3872_v25 }
 0xa90   : > { %3875 = vmatpush3.bf16.msra.mxu0 %v3872_v25  ;;  %v2672_v25 = vld [vmem:[#allocation14 + $0x10] sm:$0xff] }
 0xa91   : > { %v3876_v31 = vpack.c.bf16 %v2326_v52, %v2325_v33  ;;  %v3500_v19 = vpop.f32.mrb[16].mxu0  ;;  %v2673_v52 = vld [vmem:[#allocation14 + $0x18] sm:$0xff]  ;;  %v2674_v33 = vld [vmem:[#allocation14 + $0x20] sm:$0xff] }
 0xa92   : > { %v2328_v0 = vmul.f32 %v3500_v19, %v5238_v56  ;;  %v2278_v35 = vpop.f32.mrb[17].mxu0  ;;  %v3959_v34 = vpack.c.bf16 %v2673_v52, %v2672_v25 }
 0xa93   : > { %v2327_v42 = vmul.f32 %v2278_v35, %v5221_v49  ;;  %3877 = vmatprep.subr.bf16.mxu0 %v3876_v31  ;;  %v2677_v35 = vld [vmem:[#allocation14 + $0x38] sm:$0xff] }
 0xa94   : > { %3879 = vmatpush3.bf16.msra.mxu0 %v3876_v31  ;;  %v2675_v31 = vld [vmem:[#allocation14 + $0x28] sm:$0xff] }
 0xa95   : > { %v3880_v39 = vpack.c.bf16 %v2328_v0, %v2327_v42  ;;  %v3503_v54 = vpop.f32.mrb[18].mxu0  ;;  %v3962_v19 = vpack.c.bf16 %v2675_v31, %v2674_v33  ;;  %v2676_v0 = vld [vmem:[#allocation14 + $0x30] sm:$0xff] }
 0xa96   : > { %v2330_v28 = vmul.f32 %v3503_v54, %v5250_v63  ;;  %v2288_v60 = vpop.f32.mrb[19].mxu0  ;;  %v3965_v42 = vpack.c.bf16 %v2677_v35, %v2676_v0  ;;  %v2679_v54 = vld [vmem:[#allocation14 + $0x48] sm:$0xff] }
 0xa97   : > { %v2329_v50 = vmul.f32 %v2288_v60, %v5233_v55  ;;  %3881 = vmatprep.subr.bf16.mxu0 %v3880_v39  ;;  %v2680_v60 = vld [vmem:[#allocation14 + $0x50] sm:$0xff] }
 0xa98   : > { %3883 = vmatpush3.bf16.msra.mxu0 %v3880_v39  ;;  %v2678_v39 = vld [vmem:[#allocation14 + $0x40] sm:$0xff] }
 0xa99   : > { %v3884_v40 = vpack.c.bf16 %v2330_v28, %v2329_v50  ;;  %v3506_v37 = vpop.f32.mrb[20].mxu0  ;;  %v3968_v28 = vpack.c.bf16 %v2679_v54, %v2678_v39  ;;  %v2681_v50 = vld [vmem:[#allocation14 + $0x58] sm:$0xff] }
 0xa9a   : > { %v2332_v32 = vmul.f32 %v3506_v37, %v5262_v12  ;;  %v2298_v14 = vpop.f32.mrb[21].mxu0  ;;  %v2682_v37 = vld [vmem:[#allocation14 + $0x60] sm:$0xff] }
 0xa9b   : > { %v2331_v56 = vmul.f32 %v2298_v14, %v5245_v62  ;;  %3885 = vmatprep.subr.bf16.mxu0 %v3884_v40  ;;  %v4575_v62 = vmov 0.0|0.0  }
 0xa9c   : > { %3887 = vmatpush3.bf16.msra.mxu0 %v3884_v40  ;;  %3931 = vmatprep.subr.bf16.mxu1 %v4575_v62  ;;  %v3971_v40 = vpack.c.bf16 %v2681_v50, %v2680_v60 }
 0xa9d   : > { %v3888_v49 = vpack.c.bf16 %v2332_v32, %v2331_v56  ;;  %v3509_v20 = vpop.f32.mrb[22].mxu0  ;;  %v2683_v32 = vld [vmem:[#allocation14 + $0x68] sm:$0xff] }
 0xa9e   : > { %v2334_v43 = vmul.f32 %v3509_v20, %v5269_v5  ;;  %v2308_v44 = vpop.f32.mrb[23].mxu0  ;;  %v2583_v5 = vld [vmem:[%s5793_s3 + $0x8] sm:$0xff]  ;;  %v3974_v14 = vpack.c.bf16 %v2683_v32, %v2682_v37 }
 0xa9f   : > { %v2333_v63 = vmul.f32 %v2308_v44, %v5257_v2  ;;  %3889 = vmatprep.subr.bf16.mxu0 %v3888_v49  ;;  %v2582_v2 = vld [vmem:[%s5793_s3] sm:$0xff] }
 0xaa0   : > { %3891 = vmatpush3.bf16.msra.mxu0 %v3888_v49  ;;  %v3932_v47 = vpack.c.bf16 %v2583_v5, %v2582_v2  ;;  %v2684_v20 = vld [vmem:[#allocation14 + $0x70] sm:$0xff]  ;;  %v2762_v5 = vld [vmem:[#allocation16 + $0x20] sm:$0xff] }
 0xaa1   : > { %v3892_v55 = vpack.c.bf16 %v2334_v43, %v2333_v63  ;;  %v2685_v43 = vld [vmem:[#allocation14 + $0x78] sm:$0xff]  ;;  %v2758_v63 = vld [vmem:[#allocation16] sm:$0xff] }
 0xaa2   : > { %v3977_v44 = vpack.c.bf16 %v2685_v43, %v2684_v20 }
 0xaa3   : > { %3893 = vmatprep.subr.bf16.mxu0 %v3892_v55 }
 0xaa4   : > { %3895 = vmatpush3.bf16.msra.mxu0 %v3892_v55  ;;  %v2759_v55 = vld [vmem:[#allocation16 + $0x8] sm:$0xff] }
 0xaa5   : > { %3928 = vmatprep.subr.bf16.mxu0 %v4575_v62 }
 0xaa7   : > { %3543 = vmatmul.mubr.f32.vlgmr.msra.gmra.mrb[24].mxu0 %v2318_v45  ;;  %v2760_v45 = vld [vmem:[#allocation16 + $0x10] sm:$0xff] }
 0xaa8   : > { %3584 = vmatprep.mubr.msk.f32.mxu0 %vm4576_vm3, %v4574_v15 }
 0xb7a   : > { %v3544_v12 = vpop.f32.mrb[24].mxu0 }
 0xb7b   : > { %v2401_v46 = vpop.f32.mrb[25].mxu0 }
 0xb7c   : > { %3577 = vmatprep.mubr.f32.mxu1 %v2401_v46  ;;  %v2761_v46 = vld [vmem:[#allocation16 + $0x18] sm:$0xff] }
 0xb7d   : > { %3578 = vmatmul.mubr.f32.vlgmr.msra.gmra.mrb[32].mxu1 %v3544_v12  ;;  %v3980_v12 = vpack.c.bf16 %v2759_v55, %v2758_v63  ;;  %v3983_v2 = vpack.c.bf16 %v2761_v46, %v2760_v45 }
 0xb7e   : > { %3619 = vmatprep.mubr.msk.f32.mxu1 %vm4576_vm3, %v4574_v15  ;;  %3933 = vmatpush3.bf16.msra.mxu1 %v3932_v47  ;;  %v3986_v47 = vpack.c.bf16 %v2763_v1, %v2762_v5 }
 0xb7f   : > { %3934 = vmatprep.subr.bf16.mxu1 %v4575_v62 }
 0xb82   : > { %3936 = vmatpush3.bf16.msra.mxu1 %v3935_v4 }
 0xb83   : > { %3937 = vmatprep.subr.bf16.mxu1 %v4575_v62 }
 0xb86   : > { %3939 = vmatpush3.bf16.msra.mxu1 %v3938_v59  ;;  %v3992_v59 = vpack.c.bf16 %v2767_v58, %v2766_v53 }
 0xb87   : > { %3940 = vmatprep.subr.bf16.mxu1 %v4575_v62 }
 0xb8a   : > { %3942 = vmatpush3.bf16.msra.mxu1 %v3941_v11  ;;  %v3995_v11 = vpack.c.bf16 %v2769_v13, %v2768_v9 }
 0xb8b   : > { %3943 = vmatprep.subr.bf16.mxu1 %v4575_v62 }
 0xb8e   : > { %3945 = vmatpush3.bf16.msra.mxu1 %v3944_v61  ;;  %v3998_v61 = vpack.c.bf16 %v2771_v7, %v2770_v8 }
 0xb8f   : > { %3946 = vmatprep.subr.bf16.mxu1 %v4575_v62 }
 0xb92   : > { %3948 = vmatpush3.bf16.msra.mxu1 %v3947_v6 }
 0xb93   : > { %3949 = vmatprep.subr.bf16.mxu1 %v4575_v62 }
 0xb96   : > { %3951 = vmatpush3.bf16.msra.mxu1 %v3950_v18  ;;  %v2772_v18 = vld [vmem:[#allocation16 + $0x70] sm:$0xff] }
 0xb97   : > { %3952 = vmatprep.subr.bf16.mxu1 %v4575_v62  ;;  %v4001_v29 = vpack.c.bf16 %v2773_v26, %v2772_v18 }
 0xb9a   : > { %3954 = vmatpush3.bf16.msra.mxu1 %v3953_v10  ;;  %v2686_v10 = vld [vmem:[%s5795_s27] sm:$0x1]  ;;  %s5656_s27 = scalar_lea.hbm %s5797_s24, %s3066_s1 }
 0xb9b   : > { %3979 = vmatprep.subr.bf16.mxu1 %v4575_v62 }
 0xc50   : > { %v3579_v17 = vpop.f32.mrb[32].mxu1 }
 0xc51   : > { %v2505_v36 = vadd.f32 %v3579_v17, %v3064_v38  ;;  %v2499_v41 = vpop.f32.mrb[33].mxu1 }
 0xc52   : > { %v2500_v24 = vadd.f32 %v3064_v38, %v2499_v41  ;;  %v2774_v41 = vld [vmem:[%s5796_s25] sm:$0x1]  ;;  %s4482_s25 = scalar_lea.vmem %s4481_s0, 32 }
 0xc53   : > { %p4484_p8 = scmp.lt.s32.totalorder %s4482_s25, %s4476_s16 }
 0xc54   : > { %v3929_v27 = vpack.c.bf16 %v2505_v36, %v2500_v24 }
 0xc55   : > { %p4485_p10 = por %p4484_p8, %p4483_p2 }
 0xc56   : > { %3930 = vmatpush3.bf16.msra.mxu0 %v3929_v27 }
 0xc57   : > { %3955 = vmatprep.subr.bf16.mxu0 %v4575_v62  ;;  %p4486_p11 = pnand %p4485_p10, %p4479_p0 }
 0xc59   : > { %3585 = vmatmul.mubr.msk.f32.vlgmr.msra.gmra.mrb[26].mxu0 %vm1561_vm2, %v2508_v57 }
 0xc5a   : > { %3654 = vmatprep.mubr.msk.f32.mxu0 %vm4576_vm3, %v4574_v15  ;;  %3957 = vmatpush3.bf16.msra.mxu0 %v3956_v23 }
 0xc5b   : > { %3958 = vmatprep.subr.bf16.mxu0 %v4575_v62 }
 0xc5e   : > { %3960 = vmatpush3.bf16.msra.mxu0 %v3959_v34 }
 0xc5f   : > { %3961 = vmatprep.subr.bf16.mxu0 %v4575_v62 }
 0xc62   : > { %3963 = vmatpush3.bf16.msra.mxu0 %v3962_v19 }
 0xc63   : > { %3964 = vmatprep.subr.bf16.mxu0 %v4575_v62 }
 0xc66   : > { %3966 = vmatpush3.bf16.msra.mxu0 %v3965_v42 }
 0xc67   : > { %3967 = vmatprep.subr.bf16.mxu0 %v4575_v62 }
 0xc6a   : > { %3969 = vmatpush3.bf16.msra.mxu0 %v3968_v28 }
 0xc6b   : > { %3970 = vmatprep.subr.bf16.mxu0 %v4575_v62 }
 0xc6e   : > { %3972 = vmatpush3.bf16.msra.mxu0 %v3971_v40 }
 0xc6f   : > { %3973 = vmatprep.subr.bf16.mxu0 %v4575_v62 }
 0xc72   : > { %3975 = vmatpush3.bf16.msra.mxu0 %v3974_v14 }
 0xc73   : > { %3976 = vmatprep.subr.bf16.mxu0 %v4575_v62 }
 0xc76   : > { %3978 = vmatpush3.bf16.msra.mxu0 %v3977_v44 }
 0xd2c   : > { %v2578_v56 = vpop.f32.mrb[26].mxu0 }
 0xd2d   : > { %v3586_v49 = vpop.f32.mrb[27].mxu0  ;;  %3620 = vmatmul.mubr.f32.vlgmr.msra.gmra.mrb[34].mxu1 %v2578_v56 }
 0xd2e   : > { %3689 = vmatprep.mubr.msk.f32.mxu1 %vm4576_vm3, %v4574_v15  ;;  %3981 = vmatpush3.bf16.msra.mxu1 %v3980_v12  ;;  %v2764_v15 = vld [vmem:[#allocation16 + $0x30] sm:$0xff] }
 0xd2f   : > { %3982 = vmatprep.subr.bf16.mxu1 %v4575_v62  ;;  %v3989_v4 = vpack.c.bf16 %v2765_v48, %v2764_v15 }
 0xd32   : > { %3984 = vmatpush3.bf16.msra.mxu1 %v3983_v2 }
 0xd33   : > { %3985 = vmatprep.subr.bf16.mxu1 %v4575_v62 }
 0xd36   : > { %3987 = vmatpush3.bf16.msra.mxu1 %v3986_v47 }
 0xd37   : > { %3988 = vmatprep.subr.bf16.mxu1 %v4575_v62 }
 0xd3a   : > { %3990 = vmatpush3.bf16.msra.mxu1 %v3989_v4 }
 0xd3b   : > { %3991 = vmatprep.subr.bf16.mxu1 %v4575_v62 }
 0xd3e   : > { %3993 = vmatpush3.bf16.msra.mxu1 %v3992_v59 }
 0xd3f   : > { %3994 = vmatprep.subr.bf16.mxu1 %v4575_v62 }
 0xd42   : > { %3996 = vmatpush3.bf16.msra.mxu1 %v3995_v11 }
 0xd43   : > { %3997 = vmatprep.subr.bf16.mxu1 %v4575_v62 }
 0xd46   : > { %3999 = vmatpush3.bf16.msra.mxu1 %v3998_v61 }
 0xd47   : > { %4000 = vmatprep.subr.bf16.mxu1 %v4575_v62 }
 0xd4a   : > { %4002 = vmatpush3.bf16.msra.mxu1 %v4001_v29 }
 0xe00   : > { %v2665_v3 = vpop.f32.mrb[34].mxu1 }
 0xe01   : > { %v2666_v6 = vadd.f32 %v2665_v3, %v2598_v16  ;;  %v3621_v22 = vpop.f32.mrb[35].mxu1 }
 0xe03   : > { %v2669_v21 = vmax.f32 %v2666_v6, 0.0 }
 0xe05   : > { %3655 = vmatmul.mubr.f32.vlgmr.msra.gmra.mrb[28].mxu0 %v2669_v21 }
 0xed8   : > { %v2753_v62 = vpop.f32.mrb[28].mxu0 }
 0xed9   : > { %v2754_v38 = vadd.f32 %v2753_v62, %v2686_v10  ;;  %v3656_v17 = vpop.f32.mrb[29].mxu0 }
 0xedb   : > { %v2757_v36 = vmax.f32 %v2754_v38, 0.0 }
 0xedd   : > { %3690 = vmatmul.mubr.f32.vlgmr.msra.gmra.mrb[36].mxu1 %v2757_v36 }
 0xfb0   : > { %v2841_v24 = vpop.f32.mrb[36].mxu1 }
 0xfb1   : > { %v2842_v27 = vadd.f32 %v2841_v24, %v2774_v41  ;;  %v3691_v57 = vpop.f32.mrb[37].mxu1 }
 0xfb3   : > { %2845 = vst [vmem:[%s891_s19] sm:$0x1] %v2842_v27 }
 0xfb4   : > { %4489 = shalt.err (!%p4486_p11)
}
 0xfb5   : > { %s4490_s4 = scalar_lea.hbm %s5656_s27, 16  ;;  %s4494_s19 = scalar_lea.hbm %s5797_s24, 32 }
 0xfb6   : > { %p4491_p12 = scmp.ne.s32.totalorder %s5656_s27, %s4490_s4  ;;  %p4495_p7 = scmp.lt.u32.totalorder %s5656_s27, %s5797_s24 }
 0xfb7   : > { %p4496_p6 = scmp.lt.u32.totalorder %s4494_s19, %s4490_s4  ;;  %p4498_p4 = scmp.lt.u32.totalorder %s4490_s4, %s5656_s27 }
 0xfb8   : > { %p4492_p3 = pnand %p4491_p12, %p5798_p1 }
 0xfb9   : > { %p4497_p9 = por %p4496_p6, %p4495_p7 }
 0xfba   : > { %p4493_p5 = pneg %p4492_p3 }
 0xfbb   : > { %p4499_p13 = por %p4498_p4, %p4497_p9 }
 0xfbd   : > { %p4500_p0 = pnand %p4499_p13, %p4493_p5 }
 0xfbf   : > { %4503 = shalt.err (!%p4500_p0)
}
 0xfc0   : > { %4043 = dma.vmem_to_hbm [thread:$0]  (%p5798_p1), %s5658_s28, 16, %s5656_s27, %s2847_s5  }
 0xfc1 PF: > { %s2871_s16 = sand.u32 1, %s4546_s29   ;;  %p5799_p2 = scmp.ne.s32.totalorder %s5770_s9, 0 }
 0xfc2   : > { %p5800_p8 = scmp.ge.s32.totalorder %s4558_s30, 2  ;;  %s2872_s0 = scalar_lea.sflag [#allocation4], %s2871_s16 }
 0xfc4   : > { %p4075_p10 = pnand %p5800_p8, %p5799_p2 }
 0xfc6   : > { %4541 = dma.done.wait (!%p4075_p10), %s2872_s0, 16  }
 0xfc7   : > { %4543 = vsyncadd (!%p4075_p10), %s2872_s0, 4294967280  ;;  %p42_p11 = scmp.ge.s32.totalorder %s4934_s8, 4   ;;  %s5801_s29 = smov %s4550_s2 }
 0xfc8   : > { %s5802_s2 = smov %s4554_s6  ;;  %s5803_s6 = smov %s4945_s22 }
 0xfc9   : > { %s5804_s30 = smov %s4934_s8  ;;  %44 = sbr.rel (!%p42_p11) target bundleno = 28 (0x1c), region = 199 }
 0xfd0   :  { %2876 = vsyncpa [#allocation3], 1 }
 0xfd1   :  { %2878 = vsyncpa [#allocation3 + $0x1], 1 }
 0xfd2   :  { %2879 = vsyncpa [#allocation6], 1 }
 0xfd3   :  { %2880 = vsyncpa [#allocation9], 1 }
 0xfd4   :  { %2881 = vsyncpa [#allocation12], 1 }
 0xfd5   :  { %2882 = vsyncpa [#allocation15], 1 }
 0xfd6   :  { %2883 = vsyncpa [#allocation4], 1 }
 0xfd7   :  { %2885 = vsyncpa [#allocation4 + $0x1], 1 }

</bundles_post_ra>
